<compile_context>
chip_gen: v7x
topology: tpu7x:2x2x1
jax: 0.10.0
libtpu: 0.0.40
codegen_flags: <defaults>
</compile_context>

<pallas_src>
import functools
import math

import jax
import jax.numpy as jnp
from jax import lax
from jax.experimental import pallas as pl
from jax.experimental.pallas import tpu as pltpu


# ---------------------------------------------------------------------------
# Fused relational block kernel: QKV proj + causal MHA + out proj + Projection + residual
# ---------------------------------------------------------------------------
def _block_kernel(x_ref, a_ref, wqk_ref, bqk_ref, wv_ref, bv_ref,
                  wo_ref, bo_ref, wp_ref, bp_ref, o_ref, *, num_heads):
    # One batch element: x (S, Eq) is the query/key source, a (S, Ev) is the value
    # source and the residual target.
    x = x_ref[0].astype(jnp.float32)                      # (S, Eq)
    a = a_ref[0].astype(jnp.float32)                      # (S, Ev)
    S, Eq = x.shape
    Dh = Eq // num_heads

    # Fused Q/K projection (1/sqrt(Dh) already folded into the Q half of wqk / bqk).
    qk = jnp.dot(x, wqk_ref[...], preferred_element_type=jnp.float32) + bqk_ref[...]  # (S, 2Eq)
    v = jnp.dot(a, wv_ref[...], preferred_element_type=jnp.float32) + bv_ref[...]     # (S, Eq)

    # Square subsequent (causal) mask — same for every head.
    row = lax.broadcasted_iota(jnp.int32, (S, S), 0)
    col = lax.broadcasted_iota(jnp.int32, (S, S), 1)
    causal = col <= row

    # Per-head attention (trace-time unrolled; heads live in contiguous lane slices).
    head_outs = []
    for h in range(num_heads):
        qh = qk[:, h * Dh:(h + 1) * Dh]                   # (S, Dh), pre-scaled
        kh = qk[:, Eq + h * Dh: Eq + (h + 1) * Dh]        # (S, Dh)
        vh = v[:, h * Dh:(h + 1) * Dh]                    # (S, Dh)
        s = jnp.einsum("qd,kd->qk", qh, kh,
                       preferred_element_type=jnp.float32)            # (S, S)
        s = jnp.where(causal, s, -jnp.inf)
        m = jnp.max(s, axis=-1, keepdims=True)
        p = jnp.exp(s - m)
        w = p * pl.reciprocal(jnp.sum(p, axis=-1, keepdims=True), approx=True)
        head_outs.append(jnp.dot(w, vh, preferred_element_type=jnp.float32))  # (S, Dh)
    attn = jnp.concatenate(head_outs, axis=-1)            # (S, Eq)

    # MHA output projection, then the block's Projection Linear, then residual add.
    attn = jnp.dot(attn, wo_ref[...], preferred_element_type=jnp.float32) + bo_ref[...]   # (S, Eq)
    proj = jnp.dot(attn, wp_ref[...], preferred_element_type=jnp.float32) + bp_ref[...]   # (S, Ev)
    o_ref[0] = (a + proj).astype(o_ref.dtype)
    # NOTE: attention weights are intentionally NOT materialized/stored — the model's
    # forward() discards them (torch only stashes them in a debug cache).


def fused_relational_block(x, a, p, num_heads):
    """x: (B, S, Eq) query/key source; a: (B, S, Ev) value source & residual.
    Returns a + Proj(MHA(q=x, k=x, v=a, causal))  with shape (B, S, Ev)."""
    B, S, Eq = x.shape
    Ev = a.shape[-1]
    kernel = functools.partial(_block_kernel, num_heads=num_heads)
    return pl.pallas_call(
        kernel,
        out_shape=jax.ShapeDtypeStruct((B, S, Ev), a.dtype),
        grid=(B,),
        in_specs=[
            pl.BlockSpec((1, S, Eq), lambda b: (b, 0, 0)),
            pl.BlockSpec((1, S, Ev), lambda b: (b, 0, 0)),
            pl.BlockSpec((Eq, 2 * Eq), lambda b: (0, 0)),
            pl.BlockSpec((1, 2 * Eq), lambda b: (0, 0)),
            pl.BlockSpec((Ev, Eq), lambda b: (0, 0)),
            pl.BlockSpec((1, Eq), lambda b: (0, 0)),
            pl.BlockSpec((Eq, Eq), lambda b: (0, 0)),
            pl.BlockSpec((1, Eq), lambda b: (0, 0)),
            pl.BlockSpec((Eq, Ev), lambda b: (0, 0)),
            pl.BlockSpec((1, Ev), lambda b: (0, 0)),
        ],
        out_specs=pl.BlockSpec((1, S, Ev), lambda b: (b, 0, 0)),
        compiler_params=pltpu.CompilerParams(dimension_semantics=("parallel",)),
    )(x, a, p["wqk_t"], p["bqk"], p["wv_t"], p["bv"],
      p["wo_t"], p["bo"], p["wp_t"], p["bp"])


# ---------------------------------------------------------------------------
# Row-tiled Linear (used for the unembedding): y = x @ W^T + b
# ---------------------------------------------------------------------------
def _linear_kernel(x_ref, wt_ref, b_ref, o_ref):
    y = jnp.dot(x_ref[...], wt_ref[...], preferred_element_type=jnp.float32)
    o_ref[...] = (y + b_ref[...]).astype(o_ref.dtype)


def _pick_row_tile(n):
    for t in (512, 256, 128, 64, 32, 16, 8):
        if n % t == 0 and n // t >= 2:
            return t
    return n


def linear(x, wt, b2):
    """x: (N, Din), wt: (Din, Dout) pre-transposed, b2: (1, Dout) -> (N, Dout)."""
    N, Din = x.shape
    Dout = wt.shape[1]
    tm = _pick_row_tile(N)
    return pl.pallas_call(
        _linear_kernel,
        out_shape=jax.ShapeDtypeStruct((N, Dout), x.dtype),
        grid=(N // tm,),
        in_specs=[
            pl.BlockSpec((tm, Din), lambda i: (i, 0)),
            pl.BlockSpec((Din, Dout), lambda i: (0, 0)),
            pl.BlockSpec((1, Dout), lambda i: (0, 0)),
        ],
        out_specs=pl.BlockSpec((tm, Dout), lambda i: (i, 0)),
        compiler_params=pltpu.CompilerParams(dimension_semantics=("parallel",)),
    )(x, wt, b2)


# ---------------------------------------------------------------------------
# Model forward (batch-major internally; glue ops: embedding gather, reshapes)
# ---------------------------------------------------------------------------
def relational_model_forward(seq, params, num_heads):
    """seq: (S, B) int tokens -> logits (S, B, vocab_size)."""
    S, B = seq.shape
    x = params["embedding"][seq.T]                         # (B, S, E)   gather, batch-major
    sym = params["symbol_embedding"][:S]                   # (S, Sym)
    a = jnp.broadcast_to(sym[None, :, :], (B, S, sym.shape[-1]))  # positional symbols

    for p in params["blocks"]:                             # a = a + Proj(MHA(x, x, a))
        a = fused_relational_block(x, a, p, num_heads)
    for p in params["rev_blocks"]:                         # x = x + Proj(MHA(a, a, x))
        x = fused_relational_block(a, x, p, num_heads)

    E = x.shape[-1]
    out = linear(x.reshape(B * S, E), params["unembed_wt"], params["unembed_b2"])
    out = out.reshape(B, S, -1)
    return jnp.transpose(out, (1, 0, 2))                   # (S, B, vocab), seq-major like torch


# ---------------------------------------------------------------------------
# Deterministic parameter init (shapes from the PyTorch __init__), pre-packed for kernels:
# weights are transposed once, Wq/Wk concatenated, and 1/sqrt(Dh) folded into the Q half.
# ---------------------------------------------------------------------------
def init_params(key, vocab_size, embed_dim, symbol_dim, num_heads, num_layers, ctx_length):
    keys = iter(jax.random.split(key, 1024))

    def w(shape, scale=0.05):
        return jax.random.normal(next(keys), shape, jnp.float32) * scale

    def block_params(e_q, e_v):
        # torch-style: MultiheadAttention(embed_dim=e_q, vdim=e_v) + Linear(e_q, e_v)
        dh = e_q // num_heads
        scale = 1.0 / math.sqrt(dh)
        wq, bq = w((e_q, e_q)), w((e_q,))
        wk, bk = w((e_q, e_q)), w((e_q,))
        wv, bv = w((e_q, e_v)), w((e_q,))
        wo, bo = w((e_q, e_q)), w((e_q,))
        wp, bp = w((e_v, e_q)), w((e_v,))
        return dict(
            wqk_t=jnp.concatenate([wq * scale, wk], axis=0).T,        # (e_q, 2*e_q)
            bqk=jnp.concatenate([bq * scale, bk]).reshape(1, 2 * e_q),
            wv_t=wv.T, bv=bv.reshape(1, e_q),
            wo_t=wo.T, bo=bo.reshape(1, e_q),
            wp_t=wp.T, bp=bp.reshape(1, e_v),
        )

    unembed_w, unembed_b = w((vocab_size, embed_dim)), w((vocab_size,))
    return dict(
        embedding=w((vocab_size, embed_dim)),
        symbol_embedding=w((ctx_length, symbol_dim)),
        blocks=[block_params(embed_dim, symbol_dim) for _ in range(num_layers)],
        rev_blocks=[block_params(symbol_dim, embed_dim) for _ in range(num_layers)],
        unembed_wt=unembed_w.T,                                        # (E, vocab)
        unembed_b2=unembed_b.reshape(1, vocab_size),
    )


# ---------------------------------------------------------------------------
if __name__ == "__main__":
    vocab_size, embed_dim, symbol_dim = 16, 32, 16
    num_heads, num_layers, ctx_length = 4, 2, 9
    S, B = 8, 2                                            # seq length <= ctx_length

    key = jax.random.PRNGKey(0)
    pkey, skey = jax.random.split(key)
    params = init_params(pkey, vocab_size, embed_dim, symbol_dim,
                         num_heads, num_layers, ctx_length)
    seq = jax.random.randint(skey, (S, B), 0, vocab_size, dtype=jnp.int32)

    fwd = jax.jit(functools.partial(relational_model_forward, num_heads=num_heads))
    logits = fwd(seq, params)
    logits = jax.block_until_ready(logits)
    assert logits.shape == (S, B, vocab_size)
    assert bool(jnp.all(jnp.isfinite(logits)))
    print("KERNEL_OK")
</pallas_src>

<mosaic_0001>
module attributes {stable_mosaic.version = 11 : i64} {
  func.func @_linear_kernel(%arg0: i32, %arg1: memref<8x32xf32, #tpu.memory_space<vmem>>, %arg2: memref<32x16xf32, #tpu.memory_space<vmem>>, %arg3: memref<1x16xf32, #tpu.memory_space<vmem>>, %arg4: memref<8x16xf32, #tpu.memory_space<vmem>>) attributes {dimension_semantics = [#tpu.dimension_semantics<parallel>], iteration_bounds = array<i64: 2>, scalar_prefetch = 0 : i64, scratch_operands = 0 : i64, tpu.core_type = #tpu.core_type<tc>, window_params = [{transform_indices = @transform_0, window_bounds = array<i64: 8, 32>}, {pipeline_mode = #tpu.pipeline_mode<synchronous>, transform_indices = @transform_1, window_bounds = array<i64: 32, 16>}, {pipeline_mode = #tpu.pipeline_mode<synchronous>, transform_indices = @transform_2, window_bounds = array<i64: 1, 16>}, {transform_indices = @transform_3, window_bounds = array<i64: 8, 16>}]} {
    %c0 = arith.constant 0 : index
    %c0_0 = arith.constant 0 : index
    %0 = vector.load %arg1[%c0, %c0_0] : memref<8x32xf32, #tpu.memory_space<vmem>>, vector<8x32xf32>
    %c0_1 = arith.constant 0 : index
    %c0_2 = arith.constant 0 : index
    %1 = vector.load %arg2[%c0_1, %c0_2] : memref<32x16xf32, #tpu.memory_space<vmem>>, vector<32x16xf32>
    %cst = arith.constant dense<0.000000e+00> : vector<8x16xf32>
    %2 = tpu.matmul %0, %1, %cst {dimension_numbers = #tpu.dot_dimension_numbers<[1], [0], [0], [1], [0, 0, 1, 1], [], []>} : vector<8x32xf32>, vector<32x16xf32>, vector<8x16xf32> -> vector<8x16xf32>
    %c0_3 = arith.constant 0 : index
    %c0_4 = arith.constant 0 : index
    %3 = vector.load %arg3[%c0_3, %c0_4] : memref<1x16xf32, #tpu.memory_space<vmem>>, vector<1x16xf32>
    %4 = vector.broadcast %3 : vector<1x16xf32> to vector<8x16xf32>
    %5 = arith.addf %2, %4 : vector<8x16xf32>
    %c0_5 = arith.constant 0 : index
    %c0_6 = arith.constant 0 : index
    %6 = vector.load %arg4[%c0_5, %c0_6] : memref<8x16xf32, #tpu.memory_space<vmem>>, vector<8x16xf32>
    tpu.vector_store %arg4[%c0_5, %c0_6], %5 {strides = array<i32>} : memref<8x16xf32, #tpu.memory_space<vmem>>, vector<8x16xf32>,
    return
  }
  func.func @transform_0(%arg0: i32) -> (i32, i32) {
    %c0_i32 = arith.constant 0 : i32
    %c0_i32_0 = arith.constant 0 : i32
    return %arg0, %c0_i32 : i32, i32
  }
  func.func @transform_1(%arg0: i32) -> (i32, i32) {
    %c0_i32 = arith.constant 0 : i32
    %c0_i32_0 = arith.constant 0 : i32
    %c0_i32_1 = arith.constant 0 : i32
    return %c0_i32, %c0_i32_0 : i32, i32
  }
  func.func @transform_2(%arg0: i32) -> (i32, i32) {
    %c0_i32 = arith.constant 0 : i32
    %c0_i32_0 = arith.constant 0 : i32
    %c0_i32_1 = arith.constant 0 : i32
    return %c0_i32, %c0_i32_0 : i32, i32
  }
  func.func @transform_3(%arg0: i32) -> (i32, i32) {
    %c0_i32 = arith.constant 0 : i32
    %c0_i32_0 = arith.constant 0 : i32
    return %arg0, %c0_i32 : i32, i32
  }
}

module attributes {stable_mosaic.version = 11 : i64} {
  func.func @_block_kernel(%arg0: i32, %arg1: memref<1x8x32xf32, #tpu.memory_space<vmem>>, %arg2: memref<1x8x16xf32, #tpu.memory_space<vmem>>, %arg3: memref<32x64xf32, #tpu.memory_space<vmem>>, %arg4: memref<1x64xf32, #tpu.memory_space<vmem>>, %arg5: memref<16x32xf32, #tpu.memory_space<vmem>>, %arg6: memref<1x32xf32, #tpu.memory_space<vmem>>, %arg7: memref<32x32xf32, #tpu.memory_space<vmem>>, %arg8: memref<1x32xf32, #tpu.memory_space<vmem>>, %arg9: memref<32x16xf32, #tpu.memory_space<vmem>>, %arg10: memref<1x16xf32, #tpu.memory_space<vmem>>, %arg11: memref<1x8x16xf32, #tpu.memory_space<vmem>>) attributes {dimension_semantics = [#tpu.dimension_semantics<parallel>], iteration_bounds = array<i64: 2>, scalar_prefetch = 0 : i64, scratch_operands = 0 : i64, tpu.core_type = #tpu.core_type<tc>, window_params = [{transform_indices = @transform_0, window_bounds = array<i64: 1, 8, 32>}, {transform_indices = @transform_1, window_bounds = array<i64: 1, 8, 16>}, {pipeline_mode = #tpu.pipeline_mode<synchronous>, transform_indices = @transform_2, window_bounds = array<i64: 32, 64>}, {pipeline_mode = #tpu.pipeline_mode<synchronous>, transform_indices = @transform_3, window_bounds = array<i64: 1, 64>}, {pipeline_mode = #tpu.pipeline_mode<synchronous>, transform_indices = @transform_4, window_bounds = array<i64: 16, 32>}, {pipeline_mode = #tpu.pipeline_mode<synchronous>, transform_indices = @transform_5, window_bounds = array<i64: 1, 32>}, {pipeline_mode = #tpu.pipeline_mode<synchronous>, transform_indices = @transform_6, window_bounds = array<i64: 32, 32>}, {pipeline_mode = #tpu.pipeline_mode<synchronous>, transform_indices = @transform_7, window_bounds = array<i64: 1, 32>}, {pipeline_mode = #tpu.pipeline_mode<synchronous>, transform_indices = @transform_8, window_bounds = array<i64: 32, 16>}, {pipeline_mode = #tpu.pipeline_mode<synchronous>, transform_indices = @transform_9, window_bounds = array<i64: 1, 16>}, {transform_indices = @transform_10, window_bounds = array<i64: 1, 8, 16>}]} {
    %c0 = arith.constant 0 : index
    %c0_0 = arith.constant 0 : index
    %c0_1 = arith.constant 0 : index
    %0 = vector.load %arg1[%c0, %c0_0, %c0_1] : memref<1x8x32xf32, #tpu.memory_space<vmem>>, vector<1x8x32xf32>
    %1 = vector.shape_cast %0 : vector<1x8x32xf32> to vector<8x32xf32>
    %c0_2 = arith.constant 0 : index
    %c0_3 = arith.constant 0 : index
    %c0_4 = arith.constant 0 : index
    %2 = vector.load %arg2[%c0_2, %c0_3, %c0_4] : memref<1x8x16xf32, #tpu.memory_space<vmem>>, vector<1x8x16xf32>
    %3 = vector.shape_cast %2 : vector<1x8x16xf32> to vector<8x16xf32>
    %c0_5 = arith.constant 0 : index
    %c0_6 = arith.constant 0 : index
    %4 = vector.load %arg3[%c0_5, %c0_6] : memref<32x64xf32, #tpu.memory_space<vmem>>, vector<32x64xf32>
    %cst = arith.constant dense<0.000000e+00> : vector<8x64xf32>
    %5 = tpu.matmul %1, %4, %cst {dimension_numbers = #tpu.dot_dimension_numbers<[1], [0], [0], [1], [0, 0, 1, 1], [], []>} : vector<8x32xf32>, vector<32x64xf32>, vector<8x64xf32> -> vector<8x64xf32>
    %c0_7 = arith.constant 0 : index
    %c0_8 = arith.constant 0 : index
    %6 = vector.load %arg4[%c0_7, %c0_8] : memref<1x64xf32, #tpu.memory_space<vmem>>, vector<1x64xf32>
    %7 = vector.broadcast %6 : vector<1x64xf32> to vector<8x64xf32>
    %8 = arith.addf %5, %7 : vector<8x64xf32>
    %c0_9 = arith.constant 0 : index
    %c0_10 = arith.constant 0 : index
    %9 = vector.load %arg5[%c0_9, %c0_10] : memref<16x32xf32, #tpu.memory_space<vmem>>, vector<16x32xf32>
    %cst_11 = arith.constant dense<0.000000e+00> : vector<8x32xf32>
    %10 = tpu.matmul %3, %9, %cst_11 {dimension_numbers = #tpu.dot_dimension_numbers<[1], [0], [0], [1], [0, 0, 1, 1], [], []>} : vector<8x16xf32>, vector<16x32xf32>, vector<8x32xf32> -> vector<8x32xf32>
    %c0_12 = arith.constant 0 : index
    %c0_13 = arith.constant 0 : index
    %11 = vector.load %arg6[%c0_12, %c0_13] : memref<1x32xf32, #tpu.memory_space<vmem>>, vector<1x32xf32>
    %12 = vector.broadcast %11 : vector<1x32xf32> to vector<8x32xf32>
    %13 = arith.addf %10, %12 : vector<8x32xf32>
    %14 = tpu.iota {dimensions = array<i32: 0>} : vector<8x8xi32>
    %15 = tpu.iota {dimensions = array<i32: 1>} : vector<8x8xi32>
    %16 = arith.cmpi sle, %15, %14 : vector<8x8xi32>
    %17 = vector.extract_strided_slice %8 {offsets = [0, 0], sizes = [8, 8], strides = [1, 1]} : vector<8x64xf32> to vector<8x8xf32>
    %18 = vector.extract_strided_slice %8 {offsets = [0, 32], sizes = [8, 8], strides = [1, 1]} : vector<8x64xf32> to vector<8x8xf32>
    %19 = vector.extract_strided_slice %13 {offsets = [0, 0], sizes = [8, 8], strides = [1, 1]} : vector<8x32xf32> to vector<8x8xf32>
    "tpu.trace_start"() <{level = 10 : i32, message = "qd,kd->qk"}> : () -> ()
    %cst_14 = arith.constant dense<0.000000e+00> : vector<8x8xf32>
    %20 = tpu.matmul %17, %18, %cst_14 {dimension_numbers = #tpu.dot_dimension_numbers<[1], [1], [0], [0], [0, 0, 1, 0], [], []>} : vector<8x8xf32>, vector<8x8xf32>, vector<8x8xf32> -> vector<8x8xf32>
    %cst_15 = arith.constant 0xFF800000 : f32
    "tpu.trace_stop"() : () -> ()
    %21 = vector.broadcast %cst_15 : f32 to vector<8x8xf32>
    %22 = arith.select %16, %20, %21 : vector<8x8xi1>, vector<8x8xf32>
    %cst_16 = arith.constant dense<0xFF800000> : vector<8xf32>
    %23 = vector.multi_reduction <maximumf>, %22, %cst_16 [1] : vector<8x8xf32> to vector<8xf32>
    %24 = vector.shape_cast %23 : vector<8xf32> to vector<8x1xf32>
    %25 = vector.broadcast %24 : vector<8x1xf32> to vector<8x8xf32>
    %26 = arith.subf %22, %25 : vector<8x8xf32>
    %27 = math.exp %26 : vector<8x8xf32>
    %cst_17 = arith.constant dense<0.000000e+00> : vector<8xf32>
    %28 = vector.multi_reduction <add>, %27, %cst_17 [1] : vector<8x8xf32> to vector<8xf32>
    %29 = vector.shape_cast %28 : vector<8xf32> to vector<8x1xf32>
    %30 = tpu.reciprocal %29 {approx = true} : vector<8x1xf32> -> vector<8x1xf32>
    %31 = vector.broadcast %30 : vector<8x1xf32> to vector<8x8xf32>
    %32 = arith.mulf %27, %31 : vector<8x8xf32>
    %cst_18 = arith.constant dense<0.000000e+00> : vector<8x8xf32>
    %33 = tpu.matmul %32, %19, %cst_18 {dimension_numbers = #tpu.dot_dimension_numbers<[1], [0], [0], [1], [0, 0, 1, 1], [], []>} : vector<8x8xf32>, vector<8x8xf32>, vector<8x8xf32> -> vector<8x8xf32>
    %34 = vector.extract_strided_slice %8 {offsets = [0, 8], sizes = [8, 8], strides = [1, 1]} : vector<8x64xf32> to vector<8x8xf32>
    %35 = vector.extract_strided_slice %8 {offsets = [0, 40], sizes = [8, 8], strides = [1, 1]} : vector<8x64xf32> to vector<8x8xf32>
    %36 = vector.extract_strided_slice %13 {offsets = [0, 8], sizes = [8, 8], strides = [1, 1]} : vector<8x32xf32> to vector<8x8xf32>
    "tpu.trace_start"() <{level = 10 : i32, message = "qd,kd->qk"}> : () -> ()
    %cst_19 = arith.constant dense<0.000000e+00> : vector<8x8xf32>
    %37 = tpu.matmul %34, %35, %cst_19 {dimension_numbers = #tpu.dot_dimension_numbers<[1], [1], [0], [0], [0, 0, 1, 0], [], []>} : vector<8x8xf32>, vector<8x8xf32>, vector<8x8xf32> -> vector<8x8xf32>
    %cst_20 = arith.constant 0xFF800000 : f32
    "tpu.trace_stop"() : () -> ()
    %38 = vector.broadcast %cst_20 : f32 to vector<8x8xf32>
    %39 = arith.select %16, %37, %38 : vector<8x8xi1>, vector<8x8xf32>
    %cst_21 = arith.constant dense<0xFF800000> : vector<8xf32>
    %40 = vector.multi_reduction <maximumf>, %39, %cst_21 [1] : vector<8x8xf32> to vector<8xf32>
    %41 = vector.shape_cast %40 : vector<8xf32> to vector<8x1xf32>
    %42 = vector.broadcast %41 : vector<8x1xf32> to vector<8x8xf32>
    %43 = arith.subf %39, %42 : vector<8x8xf32>
    %44 = math.exp %43 : vector<8x8xf32>
    %cst_22 = arith.constant dense<0.000000e+00> : vector<8xf32>
    %45 = vector.multi_reduction <add>, %44, %cst_22 [1] : vector<8x8xf32> to vector<8xf32>
    %46 = vector.shape_cast %45 : vector<8xf32> to vector<8x1xf32>
    %47 = tpu.reciprocal %46 {approx = true} : vector<8x1xf32> -> vector<8x1xf32>
    %48 = vector.broadcast %47 : vector<8x1xf32> to vector<8x8xf32>
    %49 = arith.mulf %44, %48 : vector<8x8xf32>
    %cst_23 = arith.constant dense<0.000000e+00> : vector<8x8xf32>
    %50 = tpu.matmul %49, %36, %cst_23 {dimension_numbers = #tpu.dot_dimension_numbers<[1], [0], [0], [1], [0, 0, 1, 1], [], []>} : vector<8x8xf32>, vector<8x8xf32>, vector<8x8xf32> -> vector<8x8xf32>
    %51 = vector.extract_strided_slice %8 {offsets = [0, 16], sizes = [8, 8], strides = [1, 1]} : vector<8x64xf32> to vector<8x8xf32>
    %52 = vector.extract_strided_slice %8 {offsets = [0, 48], sizes = [8, 8], strides = [1, 1]} : vector<8x64xf32> to vector<8x8xf32>
    %53 = vector.extract_strided_slice %13 {offsets = [0, 16], sizes = [8, 8], strides = [1, 1]} : vector<8x32xf32> to vector<8x8xf32>
    "tpu.trace_start"() <{level = 10 : i32, message = "qd,kd->qk"}> : () -> ()
    %cst_24 = arith.constant dense<0.000000e+00> : vector<8x8xf32>
    %54 = tpu.matmul %51, %52, %cst_24 {dimension_numbers = #tpu.dot_dimension_numbers<[1], [1], [0], [0], [0, 0, 1, 0], [], []>} : vector<8x8xf32>, vector<8x8xf32>, vector<8x8xf32> -> vector<8x8xf32>
    %cst_25 = arith.constant 0xFF800000 : f32
    "tpu.trace_stop"() : () -> ()
    %55 = vector.broadcast %cst_25 : f32 to vector<8x8xf32>
    %56 = arith.select %16, %54, %55 : vector<8x8xi1>, vector<8x8xf32>
    %cst_26 = arith.constant dense<0xFF800000> : vector<8xf32>
    %57 = vector.multi_reduction <maximumf>, %56, %cst_26 [1] : vector<8x8xf32> to vector<8xf32>
    %58 = vector.shape_cast %57 : vector<8xf32> to vector<8x1xf32>
    %59 = vector.broadcast %58 : vector<8x1xf32> to vector<8x8xf32>
    %60 = arith.subf %56, %59 : vector<8x8xf32>
    %61 = math.exp %60 : vector<8x8xf32>
    %cst_27 = arith.constant dense<0.000000e+00> : vector<8xf32>
    %62 = vector.multi_reduction <add>, %61, %cst_27 [1] : vector<8x8xf32> to vector<8xf32>
    %63 = vector.shape_cast %62 : vector<8xf32> to vector<8x1xf32>
    %64 = tpu.reciprocal %63 {approx = true} : vector<8x1xf32> -> vector<8x1xf32>
    %65 = vector.broadcast %64 : vector<8x1xf32> to vector<8x8xf32>
    %66 = arith.mulf %61, %65 : vector<8x8xf32>
    %cst_28 = arith.constant dense<0.000000e+00> : vector<8x8xf32>
    %67 = tpu.matmul %66, %53, %cst_28 {dimension_numbers = #tpu.dot_dimension_numbers<[1], [0], [0], [1], [0, 0, 1, 1], [], []>} : vector<8x8xf32>, vector<8x8xf32>, vector<8x8xf32> -> vector<8x8xf32>
    %68 = vector.extract_strided_slice %8 {offsets = [0, 24], sizes = [8, 8], strides = [1, 1]} : vector<8x64xf32> to vector<8x8xf32>
    %69 = vector.extract_strided_slice %8 {offsets = [0, 56], sizes = [8, 8], strides = [1, 1]} : vector<8x64xf32> to vector<8x8xf32>
    %70 = vector.extract_strided_slice %13 {offsets = [0, 24], sizes = [8, 8], strides = [1, 1]} : vector<8x32xf32> to vector<8x8xf32>
    "tpu.trace_start"() <{level = 10 : i32, message = "qd,kd->qk"}> : () -> ()
    %cst_29 = arith.constant dense<0.000000e+00> : vector<8x8xf32>
    %71 = tpu.matmul %68, %69, %cst_29 {dimension_numbers = #tpu.dot_dimension_numbers<[1], [1], [0], [0], [0, 0, 1, 0], [], []>} : vector<8x8xf32>, vector<8x8xf32>, vector<8x8xf32> -> vector<8x8xf32>
    %cst_30 = arith.constant 0xFF800000 : f32
    "tpu.trace_stop"() : () -> ()
    %72 = vector.broadcast %cst_30 : f32 to vector<8x8xf32>
    %73 = arith.select %16, %71, %72 : vector<8x8xi1>, vector<8x8xf32>
    %cst_31 = arith.constant dense<0xFF800000> : vector<8xf32>
    %74 = vector.multi_reduction <maximumf>, %73, %cst_31 [1] : vector<8x8xf32> to vector<8xf32>
    %75 = vector.shape_cast %74 : vector<8xf32> to vector<8x1xf32>
    %76 = vector.broadcast %75 : vector<8x1xf32> to vector<8x8xf32>
    %77 = arith.subf %73, %76 : vector<8x8xf32>
    %78 = math.exp %77 : vector<8x8xf32>
    %cst_32 = arith.constant dense<0.000000e+00> : vector<8xf32>
    %79 = vector.multi_reduction <add>, %78, %cst_32 [1] : vector<8x8xf32> to vector<8xf32>
    %80 = vector.shape_cast %79 : vector<8xf32> to vector<8x1xf32>
    %81 = tpu.reciprocal %80 {approx = true} : vector<8x1xf32> -> vector<8x1xf32>
    %82 = vector.broadcast %81 : vector<8x1xf32> to vector<8x8xf32>
    %83 = arith.mulf %78, %82 : vector<8x8xf32>
    %cst_33 = arith.constant dense<0.000000e+00> : vector<8x8xf32>
    %84 = tpu.matmul %83, %70, %cst_33 {dimension_numbers = #tpu.dot_dimension_numbers<[1], [0], [0], [1], [0, 0, 1, 1], [], []>} : vector<8x8xf32>, vector<8x8xf32>, vector<8x8xf32> -> vector<8x8xf32>
    %85 = tpu.concatenate %33, %50, %67, %84 in 1 : vector<8x8xf32>, vector<8x8xf32>, vector<8x8xf32>, vector<8x8xf32> -> vector<8x32xf32>
    %c0_34 = arith.constant 0 : index
    %c0_35 = arith.constant 0 : index
    %86 = vector.load %arg7[%c0_34, %c0_35] : memref<32x32xf32, #tpu.memory_space<vmem>>, vector<32x32xf32>
    %cst_36 = arith.constant dense<0.000000e+00> : vector<8x32xf32>
    %87 = tpu.matmul %85, %86, %cst_36 {dimension_numbers = #tpu.dot_dimension_numbers<[1], [0], [0], [1], [0, 0, 1, 1], [], []>} : vector<8x32xf32>, vector<32x32xf32>, vector<8x32xf32> -> vector<8x32xf32>
    %c0_37 = arith.constant 0 : index
    %c0_38 = arith.constant 0 : index
    %88 = vector.load %arg8[%c0_37, %c0_38] : memref<1x32xf32, #tpu.memory_space<vmem>>, vector<1x32xf32>
    %89 = vector.broadcast %88 : vector<1x32xf32> to vector<8x32xf32>
    %90 = arith.addf %87, %89 : vector<8x32xf32>
    %c0_39 = arith.constant 0 : index
    %c0_40 = arith.constant 0 : index
    %91 = vector.load %arg9[%c0_39, %c0_40] : memref<32x16xf32, #tpu.memory_space<vmem>>, vector<32x16xf32>
    %cst_41 = arith.constant dense<0.000000e+00> : vector<8x16xf32>
    %92 = tpu.matmul %90, %91, %cst_41 {dimension_numbers = #tpu.dot_dimension_numbers<[1], [0], [0], [1], [0, 0, 1, 1], [], []>} : vector<8x32xf32>, vector<32x16xf32>, vector<8x16xf32> -> vector<8x16xf32>
    %c0_42 = arith.constant 0 : index
    %c0_43 = arith.constant 0 : index
    %93 = vector.load %arg10[%c0_42, %c0_43] : memref<1x16xf32, #tpu.memory_space<vmem>>, vector<1x16xf32>
    %94 = vector.broadcast %93 : vector<1x16xf32> to vector<8x16xf32>
    %95 = arith.addf %92, %94 : vector<8x16xf32>
    %96 = arith.addf %3, %95 : vector<8x16xf32>
    %c0_44 = arith.constant 0 : index
    %c0_45 = arith.constant 0 : index
    %c0_46 = arith.constant 0 : index
    %97 = vector.load %arg11[%c0_44, %c0_45, %c0_46] : memref<1x8x16xf32, #tpu.memory_space<vmem>>, vector<1x8x16xf32>
    %98 = vector.shape_cast %97 : vector<1x8x16xf32> to vector<8x16xf32>
    %99 = vector.shape_cast %96 : vector<8x16xf32> to vector<1x8x16xf32>
    tpu.vector_store %arg11[%c0_44, %c0_45, %c0_46], %99 {strides = array<i32>} : memref<1x8x16xf32, #tpu.memory_space<vmem>>, vector<1x8x16xf32>,
    return
  }
  func.func @transform_0(%arg0: i32) -> (i32, i32, i32) {
    %c0_i32 = arith.constant 0 : i32
    %c0_i32_0 = arith.constant 0 : i32
    %c0_i32_1 = arith.constant 0 : i32
    return %arg0, %c0_i32, %c0_i32_0 : i32, i32, i32
  }
  func.func @transform_1(%arg0: i32) -> (i32, i32, i32) {
    %c0_i32 = arith.constant 0 : i32
    %c0_i32_0 = arith.constant 0 : i32
    %c0_i32_1 = arith.constant 0 : i32
    return %arg0, %c0_i32, %c0_i32_0 : i32, i32, i32
  }
  func.func @transform_2(%arg0: i32) -> (i32, i32) {
    %c0_i32 = arith.constant 0 : i32
    %c0_i32_0 = arith.constant 0 : i32
    %c0_i32_1 = arith.constant 0 : i32
    return %c0_i32, %c0_i32_0 : i32, i32
  }
  func.func @transform_3(%arg0: i32) -> (i32, i32) {
    %c0_i32 = arith.constant 0 : i32
    %c0_i32_0 = arith.constant 0 : i32
    %c0_i32_1 = arith.constant 0 : i32
    return %c0_i32, %c0_i32_0 : i32, i32
  }
  func.func @transform_4(%arg0: i32) -> (i32, i32) {
    %c0_i32 = arith.constant 0 : i32
    %c0_i32_0 = arith.constant 0 : i32
    %c0_i32_1 = arith.constant 0 : i32
    return %c0_i32, %c0_i32_0 : i32, i32
  }
  func.func @transform_5(%arg0: i32) -> (i32, i32) {
    %c0_i32 = arith.constant 0 : i32
    %c0_i32_0 = arith.constant 0 : i32
    %c0_i32_1 = arith.constant 0 : i32
    return %c0_i32, %c0_i32_0 : i32, i32
  }
  func.func @transform_6(%arg0: i32) -> (i32, i32) {
    %c0_i32 = arith.constant 0 : i32
    %c0_i32_0 = arith.constant 0 : i32
    %c0_i32_1 = arith.constant 0 : i32
    return %c0_i32, %c0_i32_0 : i32, i32
  }
  func.func @transform_7(%arg0: i32) -> (i32, i32) {
    %c0_i32 = arith.constant 0 : i32
    %c0_i32_0 = arith.constant 0 : i32
    %c0_i32_1 = arith.constant 0 : i32
    return %c0_i32, %c0_i32_0 : i32, i32
  }
  func.func @transform_8(%arg0: i32) -> (i32, i32) {
    %c0_i32 = arith.constant 0 : i32
    %c0_i32_0 = arith.constant 0 : i32
    %c0_i32_1 = arith.constant 0 : i32
    return %c0_i32, %c0_i32_0 : i32, i32
  }
  func.func @transform_9(%arg0: i32) -> (i32, i32) {
    %c0_i32 = arith.constant 0 : i32
    %c0_i32_0 = arith.constant 0 : i32
    %c0_i32_1 = arith.constant 0 : i32
    return %c0_i32, %c0_i32_0 : i32, i32
  }
  func.func @transform_10(%arg0: i32) -> (i32, i32, i32) {
    %c0_i32 = arith.constant 0 : i32
    %c0_i32_0 = arith.constant 0 : i32
    %c0_i32_1 = arith.constant 0 : i32
    return %arg0, %c0_i32, %c0_i32_0 : i32, i32, i32
  }
}

module attributes {stable_mosaic.version = 11 : i64} {
  func.func @_block_kernel(%arg0: i32, %arg1: memref<1x8x16xf32, #tpu.memory_space<vmem>>, %arg2: memref<1x8x32xf32, #tpu.memory_space<vmem>>, %arg3: memref<16x32xf32, #tpu.memory_space<vmem>>, %arg4: memref<1x32xf32, #tpu.memory_space<vmem>>, %arg5: memref<32x16xf32, #tpu.memory_space<vmem>>, %arg6: memref<1x16xf32, #tpu.memory_space<vmem>>, %arg7: memref<16x16xf32, #tpu.memory_space<vmem>>, %arg8: memref<1x16xf32, #tpu.memory_space<vmem>>, %arg9: memref<16x32xf32, #tpu.memory_space<vmem>>, %arg10: memref<1x32xf32, #tpu.memory_space<vmem>>, %arg11: memref<1x8x32xf32, #tpu.memory_space<vmem>>) attributes {dimension_semantics = [#tpu.dimension_semantics<parallel>], iteration_bounds = array<i64: 2>, scalar_prefetch = 0 : i64, scratch_operands = 0 : i64, tpu.core_type = #tpu.core_type<tc>, window_params = [{transform_indices = @transform_0, window_bounds = array<i64: 1, 8, 16>}, {transform_indices = @transform_1, window_bounds = array<i64: 1, 8, 32>}, {pipeline_mode = #tpu.pipeline_mode<synchronous>, transform_indices = @transform_2, window_bounds = array<i64: 16, 32>}, {pipeline_mode = #tpu.pipeline_mode<synchronous>, transform_indices = @transform_3, window_bounds = array<i64: 1, 32>}, {pipeline_mode = #tpu.pipeline_mode<synchronous>, transform_indices = @transform_4, window_bounds = array<i64: 32, 16>}, {pipeline_mode = #tpu.pipeline_mode<synchronous>, transform_indices = @transform_5, window_bounds = array<i64: 1, 16>}, {pipeline_mode = #tpu.pipeline_mode<synchronous>, transform_indices = @transform_6, window_bounds = array<i64: 16, 16>}, {pipeline_mode = #tpu.pipeline_mode<synchronous>, transform_indices = @transform_7, window_bounds = array<i64: 1, 16>}, {pipeline_mode = #tpu.pipeline_mode<synchronous>, transform_indices = @transform_8, window_bounds = array<i64: 16, 32>}, {pipeline_mode = #tpu.pipeline_mode<synchronous>, transform_indices = @transform_9, window_bounds = array<i64: 1, 32>}, {transform_indices = @transform_10, window_bounds = array<i64: 1, 8, 32>}]} {
    %c0 = arith.constant 0 : index
    %c0_0 = arith.constant 0 : index
    %c0_1 = arith.constant 0 : index
    %0 = vector.load %arg1[%c0, %c0_0, %c0_1] : memref<1x8x16xf32, #tpu.memory_space<vmem>>, vector<1x8x16xf32>
    %1 = vector.shape_cast %0 : vector<1x8x16xf32> to vector<8x16xf32>
    %c0_2 = arith.constant 0 : index
    %c0_3 = arith.constant 0 : index
    %c0_4 = arith.constant 0 : index
    %2 = vector.load %arg2[%c0_2, %c0_3, %c0_4] : memref<1x8x32xf32, #tpu.memory_space<vmem>>, vector<1x8x32xf32>
    %3 = vector.shape_cast %2 : vector<1x8x32xf32> to vector<8x32xf32>
    %c0_5 = arith.constant 0 : index
    %c0_6 = arith.constant 0 : index
    %4 = vector.load %arg3[%c0_5, %c0_6] : memref<16x32xf32, #tpu.memory_space<vmem>>, vector<16x32xf32>
    %cst = arith.constant dense<0.000000e+00> : vector<8x32xf32>
    %5 = tpu.matmul %1, %4, %cst {dimension_numbers = #tpu.dot_dimension_numbers<[1], [0], [0], [1], [0, 0, 1, 1], [], []>} : vector<8x16xf32>, vector<16x32xf32>, vector<8x32xf32> -> vector<8x32xf32>
    %c0_7 = arith.constant 0 : index
    %c0_8 = arith.constant 0 : index
    %6 = vector.load %arg4[%c0_7, %c0_8] : memref<1x32xf32, #tpu.memory_space<vmem>>, vector<1x32xf32>
    %7 = vector.broadcast %6 : vector<1x32xf32> to vector<8x32xf32>
    %8 = arith.addf %5, %7 : vector<8x32xf32>
    %c0_9 = arith.constant 0 : index
    %c0_10 = arith.constant 0 : index
    %9 = vector.load %arg5[%c0_9, %c0_10] : memref<32x16xf32, #tpu.memory_space<vmem>>, vector<32x16xf32>
    %cst_11 = arith.constant dense<0.000000e+00> : vector<8x16xf32>
    %10 = tpu.matmul %3, %9, %cst_11 {dimension_numbers = #tpu.dot_dimension_numbers<[1], [0], [0], [1], [0, 0, 1, 1], [], []>} : vector<8x32xf32>, vector<32x16xf32>, vector<8x16xf32> -> vector<8x16xf32>
    %c0_12 = arith.constant 0 : index
    %c0_13 = arith.constant 0 : index
    %11 = vector.load %arg6[%c0_12, %c0_13] : memref<1x16xf32, #tpu.memory_space<vmem>>, vector<1x16xf32>
    %12 = vector.broadcast %11 : vector<1x16xf32> to vector<8x16xf32>
    %13 = arith.addf %10, %12 : vector<8x16xf32>
    %14 = tpu.iota {dimensions = array<i32: 0>} : vector<8x8xi32>
    %15 = tpu.iota {dimensions = array<i32: 1>} : vector<8x8xi32>
    %16 = arith.cmpi sle, %15, %14 : vector<8x8xi32>
    %17 = vector.extract_strided_slice %8 {offsets = [0, 0], sizes = [8, 4], strides = [1, 1]} : vector<8x32xf32> to vector<8x4xf32>
    %18 = vector.extract_strided_slice %8 {offsets = [0, 16], sizes = [8, 4], strides = [1, 1]} : vector<8x32xf32> to vector<8x4xf32>
    %19 = vector.extract_strided_slice %13 {offsets = [0, 0], sizes = [8, 4], strides = [1, 1]} : vector<8x16xf32> to vector<8x4xf32>
    "tpu.trace_start"() <{level = 10 : i32, message = "qd,kd->qk"}> : () -> ()
    %cst_14 = arith.constant dense<0.000000e+00> : vector<8x8xf32>
    %20 = tpu.matmul %17, %18, %cst_14 {dimension_numbers = #tpu.dot_dimension_numbers<[1], [1], [0], [0], [0, 0, 1, 0], [], []>} : vector<8x4xf32>, vector<8x4xf32>, vector<8x8xf32> -> vector<8x8xf32>
    %cst_15 = arith.constant 0xFF800000 : f32
    "tpu.trace_stop"() : () -> ()
    %21 = vector.broadcast %cst_15 : f32 to vector<8x8xf32>
    %22 = arith.select %16, %20, %21 : vector<8x8xi1>, vector<8x8xf32>
    %cst_16 = arith.constant dense<0xFF800000> : vector<8xf32>
    %23 = vector.multi_reduction <maximumf>, %22, %cst_16 [1] : vector<8x8xf32> to vector<8xf32>
    %24 = vector.shape_cast %23 : vector<8xf32> to vector<8x1xf32>
    %25 = vector.broadcast %24 : vector<8x1xf32> to vector<8x8xf32>
    %26 = arith.subf %22, %25 : vector<8x8xf32>
    %27 = math.exp %26 : vector<8x8xf32>
    %cst_17 = arith.constant dense<0.000000e+00> : vector<8xf32>
    %28 = vector.multi_reduction <add>, %27, %cst_17 [1] : vector<8x8xf32> to vector<8xf32>
    %29 = vector.shape_cast %28 : vector<8xf32> to vector<8x1xf32>
    %30 = tpu.reciprocal %29 {approx = true} : vector<8x1xf32> -> vector<8x1xf32>
    %31 = vector.broadcast %30 : vector<8x1xf32> to vector<8x8xf32>
    %32 = arith.mulf %27, %31 : vector<8x8xf32>
    %cst_18 = arith.constant dense<0.000000e+00> : vector<8x4xf32>
    %33 = tpu.matmul %32, %19, %cst_18 {dimension_numbers = #tpu.dot_dimension_numbers<[1], [0], [0], [1], [0, 0, 1, 1], [], []>} : vector<8x8xf32>, vector<8x4xf32>, vector<8x4xf32> -> vector<8x4xf32>
    %34 = vector.extract_strided_slice %8 {offsets = [0, 4], sizes = [8, 4], strides = [1, 1]} : vector<8x32xf32> to vector<8x4xf32>
    %35 = vector.extract_strided_slice %8 {offsets = [0, 20], sizes = [8, 4], strides = [1, 1]} : vector<8x32xf32> to vector<8x4xf32>
    %36 = vector.extract_strided_slice %13 {offsets = [0, 4], sizes = [8, 4], strides = [1, 1]} : vector<8x16xf32> to vector<8x4xf32>
    "tpu.trace_start"() <{level = 10 : i32, message = "qd,kd->qk"}> : () -> ()
    %cst_19 = arith.constant dense<0.000000e+00> : vector<8x8xf32>
    %37 = tpu.matmul %34, %35, %cst_19 {dimension_numbers = #tpu.dot_dimension_numbers<[1], [1], [0], [0], [0, 0, 1, 0], [], []>} : vector<8x4xf32>, vector<8x4xf32>, vector<8x8xf32> -> vector<8x8xf32>
    %cst_20 = arith.constant 0xFF800000 : f32
    "tpu.trace_stop"() : () -> ()
    %38 = vector.broadcast %cst_20 : f32 to vector<8x8xf32>
    %39 = arith.select %16, %37, %38 : vector<8x8xi1>, vector<8x8xf32>
    %cst_21 = arith.constant dense<0xFF800000> : vector<8xf32>
    %40 = vector.multi_reduction <maximumf>, %39, %cst_21 [1] : vector<8x8xf32> to vector<8xf32>
    %41 = vector.shape_cast %40 : vector<8xf32> to vector<8x1xf32>
    %42 = vector.broadcast %41 : vector<8x1xf32> to vector<8x8xf32>
    %43 = arith.subf %39, %42 : vector<8x8xf32>
    %44 = math.exp %43 : vector<8x8xf32>
    %cst_22 = arith.constant dense<0.000000e+00> : vector<8xf32>
    %45 = vector.multi_reduction <add>, %44, %cst_22 [1] : vector<8x8xf32> to vector<8xf32>
    %46 = vector.shape_cast %45 : vector<8xf32> to vector<8x1xf32>
    %47 = tpu.reciprocal %46 {approx = true} : vector<8x1xf32> -> vector<8x1xf32>
    %48 = vector.broadcast %47 : vector<8x1xf32> to vector<8x8xf32>
    %49 = arith.mulf %44, %48 : vector<8x8xf32>
    %cst_23 = arith.constant dense<0.000000e+00> : vector<8x4xf32>
    %50 = tpu.matmul %49, %36, %cst_23 {dimension_numbers = #tpu.dot_dimension_numbers<[1], [0], [0], [1], [0, 0, 1, 1], [], []>} : vector<8x8xf32>, vector<8x4xf32>, vector<8x4xf32> -> vector<8x4xf32>
    %51 = vector.extract_strided_slice %8 {offsets = [0, 8], sizes = [8, 4], strides = [1, 1]} : vector<8x32xf32> to vector<8x4xf32>
    %52 = vector.extract_strided_slice %8 {offsets = [0, 24], sizes = [8, 4], strides = [1, 1]} : vector<8x32xf32> to vector<8x4xf32>
    %53 = vector.extract_strided_slice %13 {offsets = [0, 8], sizes = [8, 4], strides = [1, 1]} : vector<8x16xf32> to vector<8x4xf32>
    "tpu.trace_start"() <{level = 10 : i32, message = "qd,kd->qk"}> : () -> ()
    %cst_24 = arith.constant dense<0.000000e+00> : vector<8x8xf32>
    %54 = tpu.matmul %51, %52, %cst_24 {dimension_numbers = #tpu.dot_dimension_numbers<[1], [1], [0], [0], [0, 0, 1, 0], [], []>} : vector<8x4xf32>, vector<8x4xf32>, vector<8x8xf32> -> vector<8x8xf32>
    %cst_25 = arith.constant 0xFF800000 : f32
    "tpu.trace_stop"() : () -> ()
    %55 = vector.broadcast %cst_25 : f32 to vector<8x8xf32>
    %56 = arith.select %16, %54, %55 : vector<8x8xi1>, vector<8x8xf32>
    %cst_26 = arith.constant dense<0xFF800000> : vector<8xf32>
    %57 = vector.multi_reduction <maximumf>, %56, %cst_26 [1] : vector<8x8xf32> to vector<8xf32>
    %58 = vector.shape_cast %57 : vector<8xf32> to vector<8x1xf32>
    %59 = vector.broadcast %58 : vector<8x1xf32> to vector<8x8xf32>
    %60 = arith.subf %56, %59 : vector<8x8xf32>
    %61 = math.exp %60 : vector<8x8xf32>
    %cst_27 = arith.constant dense<0.000000e+00> : vector<8xf32>
    %62 = vector.multi_reduction <add>, %61, %cst_27 [1] : vector<8x8xf32> to vector<8xf32>
    %63 = vector.shape_cast %62 : vector<8xf32> to vector<8x1xf32>
    %64 = tpu.reciprocal %63 {approx = true} : vector<8x1xf32> -> vector<8x1xf32>
    %65 = vector.broadcast %64 : vector<8x1xf32> to vector<8x8xf32>
    %66 = arith.mulf %61, %65 : vector<8x8xf32>
    %cst_28 = arith.constant dense<0.000000e+00> : vector<8x4xf32>
    %67 = tpu.matmul %66, %53, %cst_28 {dimension_numbers = #tpu.dot_dimension_numbers<[1], [0], [0], [1], [0, 0, 1, 1], [], []>} : vector<8x8xf32>, vector<8x4xf32>, vector<8x4xf32> -> vector<8x4xf32>
    %68 = vector.extract_strided_slice %8 {offsets = [0, 12], sizes = [8, 4], strides = [1, 1]} : vector<8x32xf32> to vector<8x4xf32>
    %69 = vector.extract_strided_slice %8 {offsets = [0, 28], sizes = [8, 4], strides = [1, 1]} : vector<8x32xf32> to vector<8x4xf32>
    %70 = vector.extract_strided_slice %13 {offsets = [0, 12], sizes = [8, 4], strides = [1, 1]} : vector<8x16xf32> to vector<8x4xf32>
    "tpu.trace_start"() <{level = 10 : i32, message = "qd,kd->qk"}> : () -> ()
    %cst_29 = arith.constant dense<0.000000e+00> : vector<8x8xf32>
    %71 = tpu.matmul %68, %69, %cst_29 {dimension_numbers = #tpu.dot_dimension_numbers<[1], [1], [0], [0], [0, 0, 1, 0], [], []>} : vector<8x4xf32>, vector<8x4xf32>, vector<8x8xf32> -> vector<8x8xf32>
    %cst_30 = arith.constant 0xFF800000 : f32
    "tpu.trace_stop"() : () -> ()
    %72 = vector.broadcast %cst_30 : f32 to vector<8x8xf32>
    %73 = arith.select %16, %71, %72 : vector<8x8xi1>, vector<8x8xf32>
    %cst_31 = arith.constant dense<0xFF800000> : vector<8xf32>
    %74 = vector.multi_reduction <maximumf>, %73, %cst_31 [1] : vector<8x8xf32> to vector<8xf32>
    %75 = vector.shape_cast %74 : vector<8xf32> to vector<8x1xf32>
    %76 = vector.broadcast %75 : vector<8x1xf32> to vector<8x8xf32>
    %77 = arith.subf %73, %76 : vector<8x8xf32>
    %78 = math.exp %77 : vector<8x8xf32>
    %cst_32 = arith.constant dense<0.000000e+00> : vector<8xf32>
    %79 = vector.multi_reduction <add>, %78, %cst_32 [1] : vector<8x8xf32> to vector<8xf32>
    %80 = vector.shape_cast %79 : vector<8xf32> to vector<8x1xf32>
    %81 = tpu.reciprocal %80 {approx = true} : vector<8x1xf32> -> vector<8x1xf32>
    %82 = vector.broadcast %81 : vector<8x1xf32> to vector<8x8xf32>
    %83 = arith.mulf %78, %82 : vector<8x8xf32>
    %cst_33 = arith.constant dense<0.000000e+00> : vector<8x4xf32>
    %84 = tpu.matmul %83, %70, %cst_33 {dimension_numbers = #tpu.dot_dimension_numbers<[1], [0], [0], [1], [0, 0, 1, 1], [], []>} : vector<8x8xf32>, vector<8x4xf32>, vector<8x4xf32> -> vector<8x4xf32>
    %85 = tpu.concatenate %33, %50, %67, %84 in 1 : vector<8x4xf32>, vector<8x4xf32>, vector<8x4xf32>, vector<8x4xf32> -> vector<8x16xf32>
    %c0_34 = arith.constant 0 : index
    %c0_35 = arith.constant 0 : index
    %86 = vector.load %arg7[%c0_34, %c0_35] : memref<16x16xf32, #tpu.memory_space<vmem>>, vector<16x16xf32>
    %cst_36 = arith.constant dense<0.000000e+00> : vector<8x16xf32>
    %87 = tpu.matmul %85, %86, %cst_36 {dimension_numbers = #tpu.dot_dimension_numbers<[1], [0], [0], [1], [0, 0, 1, 1], [], []>} : vector<8x16xf32>, vector<16x16xf32>, vector<8x16xf32> -> vector<8x16xf32>
    %c0_37 = arith.constant 0 : index
    %c0_38 = arith.constant 0 : index
    %88 = vector.load %arg8[%c0_37, %c0_38] : memref<1x16xf32, #tpu.memory_space<vmem>>, vector<1x16xf32>
    %89 = vector.broadcast %88 : vector<1x16xf32> to vector<8x16xf32>
    %90 = arith.addf %87, %89 : vector<8x16xf32>
    %c0_39 = arith.constant 0 : index
    %c0_40 = arith.constant 0 : index
    %91 = vector.load %arg9[%c0_39, %c0_40] : memref<16x32xf32, #tpu.memory_space<vmem>>, vector<16x32xf32>
    %cst_41 = arith.constant dense<0.000000e+00> : vector<8x32xf32>
    %92 = tpu.matmul %90, %91, %cst_41 {dimension_numbers = #tpu.dot_dimension_numbers<[1], [0], [0], [1], [0, 0, 1, 1], [], []>} : vector<8x16xf32>, vector<16x32xf32>, vector<8x32xf32> -> vector<8x32xf32>
    %c0_42 = arith.constant 0 : index
    %c0_43 = arith.constant 0 : index
    %93 = vector.load %arg10[%c0_42, %c0_43] : memref<1x32xf32, #tpu.memory_space<vmem>>, vector<1x32xf32>
    %94 = vector.broadcast %93 : vector<1x32xf32> to vector<8x32xf32>
    %95 = arith.addf %92, %94 : vector<8x32xf32>
    %96 = arith.addf %3, %95 : vector<8x32xf32>
    %c0_44 = arith.constant 0 : index
    %c0_45 = arith.constant 0 : index
    %c0_46 = arith.constant 0 : index
    %97 = vector.load %arg11[%c0_44, %c0_45, %c0_46] : memref<1x8x32xf32, #tpu.memory_space<vmem>>, vector<1x8x32xf32>
    %98 = vector.shape_cast %97 : vector<1x8x32xf32> to vector<8x32xf32>
    %99 = vector.shape_cast %96 : vector<8x32xf32> to vector<1x8x32xf32>
    tpu.vector_store %arg11[%c0_44, %c0_45, %c0_46], %99 {strides = array<i32>} : memref<1x8x32xf32, #tpu.memory_space<vmem>>, vector<1x8x32xf32>,
    return
  }
  func.func @transform_0(%arg0: i32) -> (i32, i32, i32) {
    %c0_i32 = arith.constant 0 : i32
    %c0_i32_0 = arith.constant 0 : i32
    %c0_i32_1 = arith.constant 0 : i32
    return %arg0, %c0_i32, %c0_i32_0 : i32, i32, i32
  }
  func.func @transform_1(%arg0: i32) -> (i32, i32, i32) {
    %c0_i32 = arith.constant 0 : i32
    %c0_i32_0 = arith.constant 0 : i32
    %c0_i32_1 = arith.constant 0 : i32
    return %arg0, %c0_i32, %c0_i32_0 : i32, i32, i32
  }
  func.func @transform_2(%arg0: i32) -> (i32, i32) {
    %c0_i32 = arith.constant 0 : i32
    %c0_i32_0 = arith.constant 0 : i32
    %c0_i32_1 = arith.constant 0 : i32
    return %c0_i32, %c0_i32_0 : i32, i32
  }
  func.func @transform_3(%arg0: i32) -> (i32, i32) {
    %c0_i32 = arith.constant 0 : i32
    %c0_i32_0 = arith.constant 0 : i32
    %c0_i32_1 = arith.constant 0 : i32
    return %c0_i32, %c0_i32_0 : i32, i32
  }
  func.func @transform_4(%arg0: i32) -> (i32, i32) {
    %c0_i32 = arith.constant 0 : i32
    %c0_i32_0 = arith.constant 0 : i32
    %c0_i32_1 = arith.constant 0 : i32
    return %c0_i32, %c0_i32_0 : i32, i32
  }
  func.func @transform_5(%arg0: i32) -> (i32, i32) {
    %c0_i32 = arith.constant 0 : i32
    %c0_i32_0 = arith.constant 0 : i32
    %c0_i32_1 = arith.constant 0 : i32
    return %c0_i32, %c0_i32_0 : i32, i32
  }
  func.func @transform_6(%arg0: i32) -> (i32, i32) {
    %c0_i32 = arith.constant 0 : i32
    %c0_i32_0 = arith.constant 0 : i32
    %c0_i32_1 = arith.constant 0 : i32
    return %c0_i32, %c0_i32_0 : i32, i32
  }
  func.func @transform_7(%arg0: i32) -> (i32, i32) {
    %c0_i32 = arith.constant 0 : i32
    %c0_i32_0 = arith.constant 0 : i32
    %c0_i32_1 = arith.constant 0 : i32
    return %c0_i32, %c0_i32_0 : i32, i32
  }
  func.func @transform_8(%arg0: i32) -> (i32, i32) {
    %c0_i32 = arith.constant 0 : i32
    %c0_i32_0 = arith.constant 0 : i32
    %c0_i32_1 = arith.constant 0 : i32
    return %c0_i32, %c0_i32_0 : i32, i32
  }
  func.func @transform_9(%arg0: i32) -> (i32, i32) {
    %c0_i32 = arith.constant 0 : i32
    %c0_i32_0 = arith.constant 0 : i32
    %c0_i32_1 = arith.constant 0 : i32
    return %c0_i32, %c0_i32_0 : i32, i32
  }
  func.func @transform_10(%arg0: i32) -> (i32, i32, i32) {
    %c0_i32 = arith.constant 0 : i32
    %c0_i32_0 = arith.constant 0 : i32
    %c0_i32_1 = arith.constant 0 : i32
    return %arg0, %c0_i32, %c0_i32_0 : i32, i32, i32
  }
}

</mosaic_0001>

<bundles_post_ra>
// kernel: relational_model_forward.9
= control target key start
LH: loop header
LB: loop body
LE: loop exit
PB: predicated region body
PF: predicated region fallthrough
CT: control target
= control target key end

     0   :  { %s382_s12 = smov 0   ;;  %s414_s0 = inlined_call_operand.vmem [shape: f32[16,32], index: 0, kind: input, shape index: {}]   ;;  %s415_s1 = inlined_call_operand.vmem [shape: f32[32,16], index: 1, kind: input, shape index: {}]   ;;  %s416_s2 = inlined_call_operand.vmem [shape: f32[1,16], index: 2, kind: input, shape index: {}]   ;;  %s417_s3 = inlined_call_operand.vmem [shape: f32[16,16], index: 3, kind: output, shape index: {}]  }
   0x1 LB: > { %s307_s13 = sadd.s32 4294967295, %s357_s12   ;;  %p311_p0 = scmp.ge.s32.totalorder %s357_s12, 1  ;;  %s357_s12 = sphi %s382_s12, %s13_s12  }
   0x2   : > { %p136_p1 = scmp.lt.s32.totalorder %s357_s12, 3 }
   0x4   : > { %p137_p2 = pnand %p311_p0, %p136_p1 }
   0x5   : > { %v167_v0 = vld [vmem:[%s415_s1] sm:$0xff] (!%p137_p2)  ;;  %v168_v1 = vld [vmem:[%s415_s1 + $0x8] sm:$0xff] (!%p137_p2)  ;;  %v169_v2 = vld [vmem:[%s415_s1 + $0x10] sm:$0xff] (!%p137_p2)  ;;  %v359_v3 = vmov (!%p137_p2), 0.0|0.0   ;;  %vm360_vm0 = vmmov (!%p137_p2), 0   ;;  %v361_v6 = vmov (!%p137_p2), 0.0  }
   0x6   : > { %140 = sbr.rel (%p137_p2) target bundleno = 232 (0xe8), region = 32  ;;  %334 = vmatprep.subr.bf16.mxu0 (!%p137_p2), %v359_v3  ;;  %v335_v4 = vpack.c.bf16 (!%p137_p2), %v168_v1, %v167_v0  ;;  %v170_v5 = vld [vmem:[%s415_s1 + $0x18] sm:$0xff] (!%p137_p2)  ;;  %331 = vmatprep.mubr.msk.f32.mxu0 (!%p137_p2), %vm360_vm0, %v361_v6  ;;  %p158_p3 = scmp.lt.s32.totalorder (!%p137_p2), %s307_s13, 1  ;;  %vm178_vm1 = vcmask (!%p137_p2), 261120   ;;  %v314_v9 = vld [vmem:[%s416_s2] ss:$0 sm:$0xff] (!%p137_p2) }
   0x7   : > { %v338_v7 = vpack.c.bf16 (!%p137_p2), %v170_v5, %v169_v2  ;;  %vm252_vm2 = vcmask (!%p137_p2), 130048  }
   0x8   : > { %336 = vmatpush3.bf16.msra.mxu0 (!%p137_p2), %v335_v4 }
   0x9   : > { %337 = vmatprep.subr.bf16.mxu0 (!%p137_p2), %v359_v3 }
   0xc   : > { %339 = vmatpush3.bf16.msra.mxu0 (!%p137_p2), %v338_v7 }
   0xd   : > { %s419_s13 = smov (!%p158_p3, %s307_s13), 1 }
   0xe   : > { %s312_s22 = sshll.u32 %s419_s13, 3 }
   0xf   : > { %s161_s25 = scalar_lea.vmem %s414_s0, %s312_s22  ;;  %s165_s30 = scalar_lea.vmem %s417_s3, %s312_s22 }
  0x10   : > { %v166_v8 = vld [vmem:[%s161_s25] sm:$0xff] }
  0x11   : > { %332 = vmatmul.mubr.msk.f32.vlgmr.msra.gmra.mrb[0].mxu0 %vm178_vm1, %v166_v8 }
  0xe4   : > { %v248_v10 = vpop.f32.mrb[0].mxu0 }
  0xe5   : > { %v249_v11 = vadd.f32 %v314_v9, %v248_v10  ;;  %v333_v12 = vpop.f32.mrb[1].mxu0 }
  0xe7   : > { %253 = vst.msk [vmem:[%s165_s30] sm:$0xff] %vm252_vm2, %v249_v11 }
  0xe8 PF: > { %s13_s12 = sadd.s32 1, %s357_s12  }
  0xe9   : > { %p10_p4 = scmp.ge.s32.totalorder %s13_s12, 4  }
  0xeb   :  { %12 = sbr.rel (!%p10_p4) target bundleno = 1 (0x1), region = 62 }

// kernel: relational_model_forward.7
= control target key start
LH: loop header
LB: loop body
LE: loop exit
PB: predicated region body
PF: predicated region fallthrough
CT: control target
= control target key end

     0   :  { %s1717_s13 = smov 0   ;;  %s1862_s0 = inlined_call_operand.vmem [shape: f32[2,8,16], index: 0, kind: input, shape index: {}]   ;;  %s1863_s1 = inlined_call_operand.vmem [shape: f32[2,8,32], index: 1, kind: input, shape index: {}]   ;;  %s1864_s2 = inlined_call_operand.vmem [shape: f32[16,32], index: 2, kind: input, shape index: {}]   ;;  %s1865_s3 = inlined_call_operand.vmem [shape: f32[1,32], index: 3, kind: input, shape index: {}]   ;;  %s1866_s4 = inlined_call_operand.vmem [shape: f32[32,16], index: 4, kind: input, shape index: {}]   ;;  %s1867_s5 = inlined_call_operand.vmem [shape: f32[1,16], index: 5, kind: input, shape index: {}]   ;;  %s1868_s6 = inlined_call_operand.vmem [shape: f32[16,16], index: 6, kind: input, shape index: {}]   ;;  %s1869_s7 = inlined_call_operand.vmem [shape: f32[1,16], index: 7, kind: input, shape index: {}]   ;;  %s1870_s8 = inlined_call_operand.vmem [shape: f32[16,32], index: 8, kind: input, shape index: {}]   ;;  %s1871_s9 = inlined_call_operand.vmem [shape: f32[1,32], index: 9, kind: input, shape index: {}]   ;;  %s1872_s10 = inlined_call_operand.vmem [shape: f32[2,8,32], index: 10, kind: output, shape index: {}]  }
   0x1 LB: > { %s1457_s14 = sadd.s32 4294967295, %s1647_s13   ;;  %p1461_p0 = scmp.ge.s32.totalorder %s1647_s13, 1  ;;  %s1647_s13 = sphi %s1717_s13, %s20_s13  }
   0x2   : > { %p320_p1 = scmp.lt.s32.totalorder %s1647_s13, 3 }
   0x4   : > { %p321_p2 = pnand %p1461_p0, %p320_p1 }
   0x5   : > { %v374_v0 = vld [vmem:[%s1864_s2] sm:$0xff] (!%p321_p2)  ;;  %v375_v1 = vld [vmem:[%s1864_s2 + $0x8] sm:$0xff] (!%p321_p2)  ;;  %p360_p3 = scmp.lt.s32.totalorder (!%p321_p2), %s1457_s14, 1  ;;  %v1649_v2 = vmov (!%p321_p2), 0.0|0.0   ;;  %vm1650_vm0 = vmmov (!%p321_p2), 0   ;;  %v1651_v4 = vmov (!%p321_p2), 0.0   ;;  %v542_v28 = vlaneseq (!%p321_p2) }
   0x6   : > { %324 = sbr.rel (%p321_p2) target bundleno = 1692 (0x69c), region = 60  ;;  %1589 = vmatprep.subr.bf16.mxu0 (!%p321_p2), %v1649_v2  ;;  %v1590_v3 = vpack.c.bf16 (!%p321_p2), %v375_v1, %v374_v0  ;;  %1521 = vmatprep.mubr.msk.f32.mxu0 (!%p321_p2), %vm1650_vm0, %v1651_v4  ;;  %vm383_vm1 = vcmask (!%p321_p2), 130048   ;;  %v457_v6 = vld [vmem:[%s1866_s4] sm:$0xff] (!%p321_p2)  ;;  %v458_v7 = vld [vmem:[%s1866_s4 + $0x8] sm:$0xff] (!%p321_p2)  ;;  %v459_v8 = vld [vmem:[%s1866_s4 + $0x10] sm:$0xff] (!%p321_p2)  ;;  %vm468_vm2 = vcmask (!%p321_p2), 261120  }
   0x7   : > { %1592 = vmatprep.subr.bf16.mxu1 (!%p321_p2), %v1649_v2  ;;  %1532 = vmatprep.mubr.msk.f32.mxu1 (!%p321_p2), %vm1650_vm0, %v1651_v4  ;;  %v1593_v9 = vpack.c.bf16 (!%p321_p2), %v458_v7, %v457_v6  ;;  %v460_v10 = vld [vmem:[%s1866_s4 + $0x18] sm:$0xff] (!%p321_p2)  ;;  %v1465_v13 = vld [vmem:[%s1865_s3] ss:$0 sm:$0xff] (!%p321_p2)  ;;  %s1652_s17 = smov (!%p321_p2), 124   ;;  %s1653_s18 = smov (!%p321_p2), 112   ;;  %vm550_vm3 = vcmask (!%p321_p2), 31744  }
   0x8   : > { %1591 = vmatpush3.bf16.msra.mxu0 (!%p321_p2), %v1590_v3  ;;  %v1596_v11 = vpack.c.bf16 (!%p321_p2), %v460_v10, %v459_v8  ;;  %s1654_s20 = smov (!%p321_p2), 104   ;;  %s1655_s21 = smov (!%p321_p2), 108   ;;  %v1467_v24 = vld [vmem:[%s1867_s5] ss:$0 sm:$0xff] (!%p321_p2)  ;;  %v543_v29 = vshrl.u32 (!%p321_p2), %v542_v28, 7  ;;  %v545_v30 = vand.u32 (!%p321_p2), 127, %v542_v28 }
   0x9   : > { %1535 = vmatprep.subr.mxu0 (!%p321_p2), %v1651_v4  ;;  %1594 = vmatpush3.bf16.msra.mxu1 (!%p321_p2), %v1593_v9  ;;  %s1657_s23 = smov (!%p321_p2), 120   ;;  %s1658_s24 = smov (!%p321_p2), 116   ;;  %vm626_vm5 = vcmask (!%p321_p2), 64512   ;;  %vm1224_vm6 = vcmask (!%p321_p2), 97280  }
   0xa   : > { %1595 = vmatprep.subr.bf16.mxu1 (!%p321_p2), %v1649_v2  ;;  %vm546_vm4 = vcmp.le.s32.totalorder (!%p321_p2), %v545_v30, %v543_v29  ;;  %s1659_s11 = smov (!%p321_p2), 4   ;;  %s1660_s12 = smov (!%p321_p2), 8  }
   0xd   : > { %s1874_s14 = smov (!%p360_p3, %s1457_s14), 1  ;;  %1597 = vmatpush3.bf16.msra.mxu1 %v1596_v11 }
   0xe   : > { %s1737_s19 = sshll.u32 %s1874_s14, 3  ;;  %1545 = vmatprep.subr.mxu1 %v1651_v4 }
   0xf   : > { %s363_s22 = scalar_lea.vmem %s1862_s0, %s1737_s19  ;;  %s367_s14 = scalar_lea.vmem %s1863_s1, %s1737_s19 }
  0x10   : > { %v372_v5 = vld [vmem:[%s363_s22] sm:$0xff]  ;;  %s1656_s22 = smov 100   ;;  %s371_s26 = scalar_lea.vmem %s1872_s10, %s1737_s19 }
  0x11   : > { %1522 = vmatmul.mubr.msk.f32.vlgmr.msra.gmra.mrb[0].mxu0 %vm383_vm1, %v372_v5  ;;  %v1765_v12 = vld [vmem:[%s367_s14] sm:$0xff]  ;;  %s1661_s14 = smov 12  }
  0x12   : > { %1537 = vmatprep.mubr.msk.f32.mxu0 %vm1650_vm0, %v1651_v4  ;;  %1533 = vmatmul.mubr.msk.f32.vlgmr.msra.gmra.mrb[0].mxu1 %vm468_vm2, %v1765_v12 }
  0x13   : > { %1547 = vmatprep.mubr.msk.f32.mxu1 %vm1650_vm0, %v1651_v4 }
  0xe4   : > { %v453_v14 = vpop.f32.mrb[0].mxu0 }
  0xe5   : > { %v454_v15 = vadd.f32 %v1465_v13, %v453_v14  ;;  %v1523_v16 = vpop.f32.mrb[1].mxu0  ;;  %v538_v25 = vpop.f32.mrb[0].mxu1 }
  0xe6   : > { %v539_v26 = vadd.f32 %v1467_v24, %v538_v25  ;;  %v1534_v27 = vpop.f32.mrb[1].mxu1 }
  0xe7   : > { %711 = vrot.lane.b32.xlu1 %v454_v15, %s1652_s17  ;;  %548 = vrot.lane.b32.xlu0 %v454_v15, %s1653_s18 }
  0xeb   : > { %880 = vrot.lane.b32.xlu1 %v454_v15, %s1654_s20  ;;  %713 = vrot.lane.b32.xlu0 %v454_v15, %s1655_s21 }
  0xef   : > { %1046 = vrot.lane.b32.xlu1 %v454_v15, %s1656_s22  ;;  %878 = vrot.lane.b32.xlu0 %v454_v15, %s1657_s23 }
  0xf3   : > { %1044 = vrot.lane.b32.xlu0 %v454_v15, %s1658_s24 }
 0x159   : > { %v712_v17 = vpop.permute.xlu1 %711  ;;  %v549_v18 = vpop.permute.xlu0 %548 }
 0x15a   : > { %1536 = vmatpush3.xpose.msk.msra.mxu0 %vm550_vm3, %v549_v18 }
 0x15b   : > { %1540 = vmatprep.subr.mxu0 %v1651_v4 }
 0x15d   : > { %1538 = vmatmul.mubr.msk.f32.vlgmr.msra.gmra.mrb[2].mxu0 %vm550_vm3, %v454_v15  ;;  %v714_v19 = vpop.permute.xlu0 %713  ;;  %v881_v20 = vpop.permute.xlu1 %880 }
 0x15e   : > { %1546 = vmatpush3.xpose.msk.msra.mxu1 %vm550_vm3, %v714_v19  ;;  %1542 = vmatprep.mubr.msk.f32.mxu0 %vm1650_vm0, %v1651_v4 }
 0x15f   : > { %1555 = vmatprep.subr.mxu1 %v1651_v4  ;;  %1541 = vmatpush3.msra.mxu0 %v539_v26 }
 0x160   : > { %1550 = vmatprep.subr.mxu0 %v1651_v4 }
 0x161   : > { %1548 = vmatmul.mubr.msk.f32.vlgmr.msra.gmra.mrb[2].mxu1 %vm550_vm3, %v712_v17  ;;  %v879_v21 = vpop.permute.xlu0 %878  ;;  %v1047_v22 = vpop.permute.xlu1 %1046 }
 0x162   : > { %1556 = vmatpush3.xpose.msk.msra.mxu1 %vm550_vm3, %v881_v20  ;;  %1557 = vmatprep.mubr.msk.f32.mxu1 %vm1650_vm0, %v1651_v4 }
 0x163   : > { %1565 = vmatprep.subr.mxu1 %v1651_v4 }
 0x165   : > { %1558 = vmatmul.mubr.msk.f32.vlgmr.msra.gmra.mrb[4].mxu1 %vm550_vm3, %v879_v21  ;;  %v1045_v23 = vpop.permute.xlu0 %1044  ;;  %v1226_v21 = vld [vmem:[%s1868_s6] sm:$0xff] }
 0x166   : > { %1566 = vmatpush3.xpose.msk.msra.mxu1 %vm550_vm3, %v1047_v22  ;;  %1567 = vmatprep.mubr.msk.f32.mxu1 %vm1650_vm0, %v1651_v4  ;;  %v1227_v22 = vld [vmem:[%s1868_s6 + $0x8] sm:$0xff] }
 0x167   : > { %1598 = vmatprep.subr.bf16.mxu1 %v1649_v2 }
 0x169   : > { %1568 = vmatmul.mubr.msk.f32.vlgmr.msra.gmra.mrb[6].mxu1 %vm550_vm3, %v1045_v23  ;;  %v1599_v23 = vpack.c.bf16 %v1227_v22, %v1226_v21 }
 0x16a   : > { %1579 = vmatprep.mubr.msk.f32.mxu1 %vm1650_vm0, %v1651_v4 }
 0x16b   : > { %1600 = vmatpush3.bf16.msra.mxu1 %v1599_v23 }
 0x230   : > { %v621_v31 = vpop.f32.mrb[2].mxu0 }
 0x231   : > { %v625_v32 = vsel %vm546_vm4, %v621_v31, -inf  ;;  %v1539_v33 = vpop.f32.mrb[3].mxu0 }
 0x232   : > { %v627_v34 = vsel %vm626_vm5, %v625_v32, -inf }
 0x233   : > { %628 = vmax.xlane.f32.xlu1 %v627_v34 }
 0x234   : > { %v785_v35 = vpop.f32.mrb[2].mxu1 }
 0x235   : > { %v789_v36 = vsel %vm546_vm4, %v785_v35, -inf  ;;  %v1549_v37 = vpop.f32.mrb[3].mxu1 }
 0x236   : > { %v790_v38 = vsel %vm626_vm5, %v789_v36, -inf  ;;  %v1309_v37 = vld [vmem:[%s1870_s8 + $0x8] sm:$0xff] }
 0x237   : > { %791 = vmax.xlane.f32.xlu0 %v790_v38 }
 0x238   : > { %v952_v39 = vpop.f32.mrb[4].mxu1 }
 0x239   : > { %v956_v40 = vsel %vm546_vm4, %v952_v39, -inf  ;;  %v1559_v41 = vpop.f32.mrb[5].mxu1  ;;  %v1481_v39 = vld [vmem:[%s1869_s7] ss:$0 sm:$0xff] }
 0x23a   : > { %v957_v42 = vsel %vm626_vm5, %v956_v40, -inf }
 0x23b   : > { %958 = vmax.xlane.f32.xlu0 %v957_v42 }
 0x23c   : > { %v1118_v43 = vpop.f32.mrb[6].mxu1 }
 0x23d   : > { %v1122_v44 = vsel %vm546_vm4, %v1118_v43, -inf  ;;  %v1569_v45 = vpop.f32.mrb[7].mxu1  ;;  %v1483_v43 = vld [vmem:[%s1871_s9] ss:$0 sm:$0xff] }
 0x23e   : > { %v1123_v46 = vsel %vm626_vm5, %v1122_v44, -inf }
 0x23f   : > { %1124 = vmax.xlane.f32.xlu1 %v1123_v46 }
 0x2c0   : > { %v629_v47 = vpop.xlane.xlu1 %628 }
 0x2c1   : > { %v630_v48 = vsub.f32 %v625_v32, %v629_v47 }
 0x2c3   : > { %v631_v49 = vmul.f32 1.442695, %v630_v48 }
 0x2c4   : > { %v792_v50 = vpop.xlane.xlu0 %791 }
 0x2c5   : > { %1625 = vpow2.f32 %v631_v49  ;;  %v793_v51 = vsub.f32 %v789_v36, %v792_v50  ;;  %v1308_v36 = vld [vmem:[%s1870_s8] sm:$0xff] }
 0x2c6   : > { %v1602_v38 = vpack.c.bf16 %v1309_v37, %v1308_v36 }
 0x2c7   : > { %v794_v52 = vmul.f32 1.442695, %v793_v51 }
 0x2c8   : > { %v959_v53 = vpop.xlane.xlu0 %958 }
 0x2c9   : > { %1627 = vpow2.f32 %v794_v52  ;;  %v960_v54 = vsub.f32 %v956_v40, %v959_v53 }
 0x2cb   : > { %v961_v55 = vmul.f32 1.442695, %v960_v54 }
 0x2cc   : > { %v1125_v62 = vpop.xlane.xlu1 %1124 }
 0x2cd   : > { %1629 = vpow2.f32 %v961_v55  ;;  %v1126_v63 = vsub.f32 %v1122_v44, %v1125_v62 }
 0x2cf   : > { %v1626_v56 = vpop.eup %1625  ;;  %v1127_v0 = vmul.f32 1.442695, %v1126_v63 }
 0x2d0   : > { %v633_v57 = vsel %vm626_vm5, %v1626_v56, 0.0 }
 0x2d1   : > { %634 = vadd.xlane.f32.xlu0 %v633_v57  ;;  %1631 = vpow2.f32 %v1127_v0 }
 0x2d3   : > { %v1628_v58 = vpop.eup %1627 }
 0x2d4   : > { %v796_v59 = vsel %vm626_vm5, %v1628_v58, 0.0 }
 0x2d5   : > { %797 = vadd.xlane.f32.xlu1 %v796_v59 }
 0x2d7   : > { %v1630_v60 = vpop.eup %1629 }
 0x2d8   : > { %v963_v61 = vsel %vm626_vm5, %v1630_v60, 0.0 }
 0x2d9   : > { %964 = vadd.xlane.f32.xlu0 %v963_v61 }
 0x2db   : > { %v1632_v1 = vpop.eup %1631 }
 0x2dc   : > { %v1129_v3 = vsel %vm626_vm5, %v1632_v1, 0.0 }
 0x2e6   : > { %968 = vrot.lane.b32.xlu1 %v539_v26, %s1657_s23 }
 0x2ef   : > { %802 = vrot.lane.b32.xlu0 %v539_v26, %s1652_s17 }
 0x30a   : > { %1130 = vadd.xlane.f32.xlu1 %v1129_v3 }
 0x31b   : > { %1134 = vrot.lane.b32.xlu1 %v539_v26, %s1658_s24 }
 0x35e   : > { %v635_v5 = vpop.xlane.xlu0 %634 }
 0x35f   : > { %1633 = vrcp.f32 %v635_v5 }
 0x362   : > { %v798_v6 = vpop.xlane.xlu1 %797 }
 0x363   : > { %1635 = vrcp.f32 %v798_v6 }
 0x366   : > { %v965_v7 = vpop.xlane.xlu0 %964  ;;  %v969_v14 = vpop.permute.xlu1 %968 }
 0x367   : > { %1637 = vrcp.f32 %v965_v7 }
 0x369   : > { %v1634_v8 = vpop.eup %1633 }
 0x36a   : > { %v637_v9 = vmul.f32 %v1634_v8, %v1626_v56  ;;  %v803_v10 = vpop.permute.xlu0 %802 }
 0x36c   : > { %1543 = vmatmul.mubr.msk.f32.vlgmr.msra.gmra.mrb[4].mxu0 %vm626_vm5, %v637_v9 }
 0x36d   : > { %v1636_v11 = vpop.eup %1635  ;;  %1551 = vmatpush3.msra.mxu0 %v803_v10  ;;  %1552 = vmatprep.mubr.msk.f32.mxu0 %vm1650_vm0, %v1651_v4 }
 0x36e   : > { %v800_v13 = vmul.f32 %v1636_v11, %v1628_v58  ;;  %1560 = vmatprep.subr.mxu0 %v1651_v4 }
 0x370   : > { %1553 = vmatmul.mubr.msk.f32.vlgmr.msra.gmra.mrb[6].mxu0 %vm626_vm5, %v800_v13 }
 0x371   : > { %v1638_v15 = vpop.eup %1637  ;;  %1561 = vmatpush3.msra.mxu0 %v969_v14  ;;  %1562 = vmatprep.mubr.msk.f32.mxu0 %vm1650_vm0, %v1651_v4 }
 0x372   : > { %v967_v16 = vmul.f32 %v1638_v15, %v1630_v60  ;;  %1570 = vmatprep.subr.mxu0 %v1651_v4 }
 0x374   : > { %1563 = vmatmul.mubr.msk.f32.vlgmr.msra.gmra.mrb[8].mxu0 %vm626_vm5, %v967_v16 }
 0x375   : > { %1572 = vmatprep.mubr.msk.f32.mxu0 %vm1650_vm0, %v1651_v4 }
 0x397   : > { %v1131_v17 = vpop.xlane.xlu1 %1130 }
 0x398   : > { %1639 = vrcp.f32 %v1131_v17 }
 0x39b   : > { %v1135_v18 = vpop.permute.xlu1 %1134 }
 0x39c   : > { %1571 = vmatpush3.msra.mxu0 %v1135_v18 }
 0x39d   : > { %1601 = vmatprep.subr.bf16.mxu0 %v1649_v2 }
 0x3a2   : > { %v1640_v19 = vpop.eup %1639 }
 0x3a3   : > { %v1133_v20 = vmul.f32 %v1640_v19, %v1632_v1 }
 0x3a5   : > { %1573 = vmatmul.mubr.msk.f32.vlgmr.msra.gmra.mrb[10].mxu0 %vm626_vm5, %v1133_v20 }
 0x3a6   : > { %1586 = vmatprep.mubr.msk.f32.mxu0 %vm1650_vm0, %v1651_v4  ;;  %1603 = vmatpush3.bf16.msra.mxu0 %v1602_v38 }
 0x43f   : > { %v707_v24 = vpop.f32.mrb[4].mxu0 }
 0x440   : > { %v1544_v25 = vpop.f32.mrb[5].mxu0 }
 0x443   : > { %v874_v2 = vpop.f32.mrb[6].mxu0 }
 0x444   : > { %1211 = vrot.lane.b32.xlu0 %v874_v2, %s1659_s11  ;;  %v1554_v26 = vpop.f32.mrb[7].mxu0 }
 0x447   : > { %v1040_v27 = vpop.f32.mrb[8].mxu0 }
 0x448   : > { %1215 = vrot.lane.b32.xlu1 %v1040_v27, %s1660_s12  ;;  %v1564_v4 = vpop.f32.mrb[9].mxu0 }
 0x478   : > { %v1206_v28 = vpop.f32.mrb[10].mxu0 }
 0x479   : > { %1219 = vrot.lane.b32.xlu0 %v1206_v28, %s1661_s14  ;;  %v1574_v29 = vpop.f32.mrb[11].mxu0 }
 0x4b6   : > { %v1212_v30 = vpop.permute.xlu0 %1211 }
 0x4b7   : > { %v1222_v32 = vsel %vm550_vm3, %v707_v24, %v1212_v30 }
 0x4ba   : > { %v1216_v31 = vpop.permute.xlu1 %1215 }
 0x4bb   : > { %v1223_v33 = vsel %vm626_vm5, %v1222_v32, %v1216_v31 }
 0x4eb   : > { %v1220_v34 = vpop.permute.xlu0 %1219 }
 0x4ec   : > { %v1225_v35 = vsel %vm1224_vm6, %v1223_v33, %v1220_v34 }
 0x4ed   : > { %1580 = vmatmul.mubr.msk.f32.vlgmr.msra.gmra.mrb[8].mxu1 %vm383_vm1, %v1225_v35 }
 0x5c0   : > { %v1304_v40 = vpop.f32.mrb[8].mxu1 }
 0x5c1   : > { %v1305_v41 = vadd.f32 %v1481_v39, %v1304_v40  ;;  %v1581_v42 = vpop.f32.mrb[9].mxu1 }
 0x5c3   : > { %1587 = vmatmul.mubr.msk.f32.vlgmr.msra.gmra.mrb[12].mxu0 %vm383_vm1, %v1305_v41 }
 0x696   : > { %v1386_v44 = vpop.f32.mrb[12].mxu0 }
 0x697   : > { %v1387_v45 = vadd.f32 %v1483_v43, %v1386_v44  ;;  %v1588_v46 = vpop.f32.mrb[13].mxu0 }
 0x699   : > { %v1390_v47 = vadd.f32 %v1387_v45, %v1765_v12 }
 0x69b   : > { %1391 = vst.msk [vmem:[%s371_s26] sm:$0xff] %vm468_vm2, %v1390_v47 }
 0x69c PF: > { %s20_s13 = sadd.s32 1, %s1647_s13  }
 0x69d   : > { %p17_p4 = scmp.ge.s32.totalorder %s20_s13, 4  }
 0x69f   :  { %19 = sbr.rel (!%p17_p4) target bundleno = 1 (0x1), region = 93 }

// kernel: relational_model_forward.5
= control target key start
LH: loop header
LB: loop body
LE: loop exit
PB: predicated region body
PF: predicated region fallthrough
CT: control target
= control target key end

     0   :  { %s1738_s13 = smov 0   ;;  %s1903_s0 = inlined_call_operand.vmem [shape: f32[2,8,32], index: 0, kind: input, shape index: {}]   ;;  %s1904_s1 = inlined_call_operand.vmem [shape: f32[2,8,16], index: 1, kind: input, shape index: {}]   ;;  %s1905_s2 = inlined_call_operand.vmem [shape: f32[32,64], index: 2, kind: input, shape index: {}]   ;;  %s1906_s3 = inlined_call_operand.vmem [shape: f32[1,64], index: 3, kind: input, shape index: {}]   ;;  %s1907_s4 = inlined_call_operand.vmem [shape: f32[16,32], index: 4, kind: input, shape index: {}]   ;;  %s1908_s5 = inlined_call_operand.vmem [shape: f32[1,32], index: 5, kind: input, shape index: {}]   ;;  %s1909_s6 = inlined_call_operand.vmem [shape: f32[32,32], index: 6, kind: input, shape index: {}]   ;;  %s1910_s7 = inlined_call_operand.vmem [shape: f32[1,32], index: 7, kind: input, shape index: {}]   ;;  %s1911_s8 = inlined_call_operand.vmem [shape: f32[32,16], index: 8, kind: input, shape index: {}]   ;;  %s1912_s9 = inlined_call_operand.vmem [shape: f32[1,16], index: 9, kind: input, shape index: {}]   ;;  %s1913_s10 = inlined_call_operand.vmem [shape: f32[2,8,16], index: 10, kind: output, shape index: {}]  }
   0x1 LB: > { %s1460_s14 = sadd.s32 4294967295, %s1668_s13   ;;  %p1464_p0 = scmp.ge.s32.totalorder %s1668_s13, 1  ;;  %s1668_s13 = sphi %s1738_s13, %s20_s13  }
   0x2   : > { %p320_p1 = scmp.lt.s32.totalorder %s1668_s13, 3 }
   0x4   : > { %p321_p2 = pnand %p1464_p0, %p320_p1 }
   0x5   : > { %v374_v0 = vld [vmem:[%s1905_s2] sm:$0xff] (!%p321_p2)  ;;  %v375_v1 = vld [vmem:[%s1905_s2 + $0x8] sm:$0xff] (!%p321_p2)  ;;  %v376_v2 = vld [vmem:[%s1905_s2 + $0x10] sm:$0xff] (!%p321_p2)  ;;  %v1670_v3 = vmov (!%p321_p2), 0.0|0.0   ;;  %vm1671_vm0 = vmmov (!%p321_p2), 0   ;;  %v1672_v6 = vmov (!%p321_p2), 0.0   ;;  %v542_v28 = vlaneseq (!%p321_p2) }
   0x6   : > { %324 = sbr.rel (%p321_p2) target bundleno = 1692 (0x69c), region = 60  ;;  %1604 = vmatprep.subr.bf16.mxu0 (!%p321_p2), %v1670_v3  ;;  %v1605_v4 = vpack.c.bf16 (!%p321_p2), %v375_v1, %v374_v0  ;;  %v377_v5 = vld [vmem:[%s1905_s2 + $0x18] sm:$0xff] (!%p321_p2)  ;;  %1532 = vmatprep.mubr.msk.f32.mxu0 (!%p321_p2), %vm1671_vm0, %v1672_v6  ;;  %p360_p3 = scmp.lt.s32.totalorder (!%p321_p2), %s1460_s14, 1  ;;  %vm385_vm1 = vcmask (!%p321_p2), 261120   ;;  %v459_v9 = vld [vmem:[%s1907_s4] sm:$0xff] (!%p321_p2)  ;;  %v460_v10 = vld [vmem:[%s1907_s4 + $0x8] sm:$0xff] (!%p321_p2) }
   0x7   : > { %1610 = vmatprep.subr.bf16.mxu1 (!%p321_p2), %v1670_v3  ;;  %1539 = vmatprep.mubr.msk.f32.mxu1 (!%p321_p2), %vm1671_vm0, %v1672_v6  ;;  %v1608_v7 = vpack.c.bf16 (!%p321_p2), %v377_v5, %v376_v2  ;;  %v1611_v11 = vpack.c.bf16 (!%p321_p2), %v460_v10, %v459_v9  ;;  %vm468_vm2 = vcmask (!%p321_p2), 130048   ;;  %v1468_v13 = vld [vmem:[%s1906_s3] ss:$0 sm:$0xff] (!%p321_p2)  ;;  %s1673_s17 = smov (!%p321_p2), 120   ;;  %s1674_s18 = smov (!%p321_p2), 96   ;;  %vm550_vm3 = vcmask (!%p321_p2), 64512  }
   0x8   : > { %1606 = vmatpush3.bf16.msra.mxu0 (!%p321_p2), %v1605_v4  ;;  %s1675_s19 = smov (!%p321_p2), 80   ;;  %s1676_s20 = smov (!%p321_p2), 88   ;;  %v1470_v17 = vld [vmem:[%s1908_s5] ss:$0 sm:$0xff] (!%p321_p2)  ;;  %v543_v29 = vshrl.u32 (!%p321_p2), %v542_v28, 7  ;;  %v545_v30 = vand.u32 (!%p321_p2), 127, %v542_v28 }
   0x9   : > { %1607 = vmatprep.subr.bf16.mxu0 (!%p321_p2), %v1670_v3  ;;  %1612 = vmatpush3.bf16.msra.mxu1 (!%p321_p2), %v1611_v11  ;;  %s1677_s21 = smov (!%p321_p2), 72   ;;  %s1678_s22 = smov (!%p321_p2), 112   ;;  %vm1223_vm5 = vcmask (!%p321_p2), 195584  }
   0xa   : > { %1542 = vmatprep.subr.mxu1 (!%p321_p2), %v1672_v6  ;;  %s1679_s24 = smov (!%p321_p2), 104   ;;  %vm546_vm4 = vcmp.le.s32.totalorder (!%p321_p2), %v545_v30, %v543_v29  ;;  %s1680_s16 = smov (!%p321_p2), 8  }
   0xc   : > { %1609 = vmatpush3.bf16.msra.mxu0 (!%p321_p2), %v1608_v7 }
   0xd   : > { %s1915_s14 = smov (!%p360_p3, %s1460_s14), 1  ;;  %1547 = vmatprep.subr.mxu0 %v1672_v6 }
   0xe   : > { %s1765_s23 = sshll.u32 %s1915_s14, 3 }
   0xf   : > { %s363_s26 = scalar_lea.vmem %s1903_s0, %s1765_s23  ;;  %s367_s14 = scalar_lea.vmem %s1904_s1, %s1765_s23 }
  0x10   : > { %v372_v8 = vld [vmem:[%s363_s26] sm:$0xff]  ;;  %s371_s15 = scalar_lea.vmem %s1913_s10, %s1765_s23 }
  0x11   : > { %1533 = vmatmul.mubr.msk.f32.vlgmr.msra.gmra.mrb[0].mxu0 %vm385_vm1, %v372_v8  ;;  %v1785_v12 = vld [vmem:[%s367_s14] sm:$0xff] }
  0x12   : > { %1549 = vmatprep.mubr.msk.f32.mxu0 %vm1671_vm0, %v1672_v6  ;;  %1540 = vmatmul.mubr.msk.f32.vlgmr.msra.gmra.mrb[0].mxu1 %vm468_vm2, %v1785_v12 }
  0x13   : > { %1544 = vmatprep.mubr.msk.f32.mxu1 %vm1671_vm0, %v1672_v6 }
  0xe4   : > { %v455_v14 = vpop.f32.mrb[0].mxu0 }
  0xe5   : > { %v456_v15 = vadd.f32 %v1468_v13, %v455_v14  ;;  %v1534_v16 = vpop.f32.mrb[1].mxu0  ;;  %v538_v18 = vpop.f32.mrb[0].mxu1 }
  0xe6   : > { %v1801_v19 = vadd.f32 %v1470_v17, %v538_v18  ;;  %v1541_v20 = vpop.f32.mrb[1].mxu1 }
  0xe7   : > { %710 = vrot.lane.b32.xlu1 %v456_v15, %s1673_s17  ;;  %548 = vrot.lane.b32.xlu0 %v456_v15, %s1674_s18 }
  0xe8   : > { %1548 = vmatpush3.msra.mxu0 %v1801_v19 }
  0xe9   : > { %1557 = vmatprep.subr.mxu0 %v1672_v6 }
  0xeb   : > { %879 = vrot.lane.b32.xlu1 %v456_v15, %s1675_s19  ;;  %712 = vrot.lane.b32.xlu0 %v456_v15, %s1676_s20 }
  0xef   : > { %1045 = vrot.lane.b32.xlu1 %v456_v15, %s1677_s21  ;;  %877 = vrot.lane.b32.xlu0 %v456_v15, %s1678_s22 }
  0xf3   : > { %1043 = vrot.lane.b32.xlu0 %v456_v15, %s1679_s24 }
 0x159   : > { %v711_v21 = vpop.permute.xlu1 %710  ;;  %v549_v22 = vpop.permute.xlu0 %548 }
 0x15a   : > { %1543 = vmatpush3.xpose.msk.msra.mxu1 %vm550_vm3, %v549_v22  ;;  %v1226_v22 = vld [vmem:[%s1909_s6 + $0x8] sm:$0xff] }
 0x15b   : > { %1552 = vmatprep.subr.mxu1 %v1672_v6 }
 0x15d   : > { %1545 = vmatmul.mubr.msk.f32.vlgmr.msra.gmra.mrb[2].mxu1 %vm550_vm3, %v456_v15  ;;  %v713_v23 = vpop.permute.xlu0 %712  ;;  %v880_v24 = vpop.permute.xlu1 %879 }
 0x15e   : > { %1553 = vmatpush3.xpose.msk.msra.mxu1 %vm550_vm3, %v713_v23  ;;  %1554 = vmatprep.mubr.msk.f32.mxu1 %vm1671_vm0, %v1672_v6  ;;  %v1227_v23 = vld [vmem:[%s1909_s6 + $0x10] sm:$0xff] }
 0x15f   : > { %1562 = vmatprep.subr.mxu1 %v1672_v6 }
 0x161   : > { %1555 = vmatmul.mubr.msk.f32.vlgmr.msra.gmra.mrb[4].mxu1 %vm550_vm3, %v711_v21  ;;  %v878_v25 = vpop.permute.xlu0 %877  ;;  %v1046_v26 = vpop.permute.xlu1 %1045  ;;  %v1225_v21 = vld [vmem:[%s1909_s6] sm:$0xff] }
 0x162   : > { %1563 = vmatpush3.xpose.msk.msra.mxu1 %vm550_vm3, %v880_v24  ;;  %1564 = vmatprep.mubr.msk.f32.mxu1 %vm1671_vm0, %v1672_v6  ;;  %v1614_v24 = vpack.c.bf16 %v1226_v22, %v1225_v21 }
 0x163   : > { %1572 = vmatprep.subr.mxu1 %v1672_v6 }
 0x165   : > { %1565 = vmatmul.mubr.msk.f32.vlgmr.msra.gmra.mrb[6].mxu1 %vm550_vm3, %v878_v25  ;;  %v1044_v27 = vpop.permute.xlu0 %1043  ;;  %v1228_v25 = vld [vmem:[%s1909_s6 + $0x18] sm:$0xff] }
 0x166   : > { %1573 = vmatpush3.xpose.msk.msra.mxu1 %vm550_vm3, %v1046_v26  ;;  %1574 = vmatprep.mubr.msk.f32.mxu1 %vm1671_vm0, %v1672_v6  ;;  %v1617_v26 = vpack.c.bf16 %v1228_v25, %v1227_v23 }
 0x167   : > { %1613 = vmatprep.subr.bf16.mxu1 %v1670_v3 }
 0x169   : > { %1575 = vmatmul.mubr.msk.f32.vlgmr.msra.gmra.mrb[8].mxu1 %vm550_vm3, %v1044_v27 }
 0x16a   : > { %1590 = vmatprep.mubr.msk.f32.mxu1 %vm1671_vm0, %v1672_v6  ;;  %1615 = vmatpush3.bf16.msra.mxu1 %v1614_v24 }
 0x16b   : > { %1616 = vmatprep.subr.bf16.mxu1 %v1670_v3 }
 0x16e   : > { %1618 = vmatpush3.bf16.msra.mxu1 %v1617_v26 }
 0x230   : > { %v621_v31 = vpop.f32.mrb[2].mxu1 }
 0x231   : > { %v625_v32 = vsel %vm546_vm4, %v621_v31, -inf  ;;  %v1546_v33 = vpop.f32.mrb[3].mxu1 }
 0x232   : > { %v626_v34 = vsel %vm550_vm3, %v625_v32, -inf  ;;  %v1310_v33 = vld [vmem:[%s1911_s8 + $0x8] sm:$0xff] }
 0x233   : > { %627 = vmax.xlane.f32.xlu1 %v626_v34 }
 0x234   : > { %v784_v35 = vpop.f32.mrb[4].mxu1 }
 0x235   : > { %v788_v36 = vsel %vm546_vm4, %v784_v35, -inf  ;;  %v1556_v37 = vpop.f32.mrb[5].mxu1 }
 0x236   : > { %v789_v38 = vsel %vm550_vm3, %v788_v36, -inf }
 0x237   : > { %790 = vmax.xlane.f32.xlu0 %v789_v38 }
 0x238   : > { %v951_v39 = vpop.f32.mrb[6].mxu1 }
 0x239   : > { %v955_v40 = vsel %vm546_vm4, %v951_v39, -inf  ;;  %v1566_v41 = vpop.f32.mrb[7].mxu1 }
 0x23a   : > { %v956_v42 = vsel %vm550_vm3, %v955_v40, -inf }
 0x23b   : > { %957 = vmax.xlane.f32.xlu0 %v956_v42 }
 0x23c   : > { %v1117_v43 = vpop.f32.mrb[8].mxu1 }
 0x23d   : > { %v1121_v44 = vsel %vm546_vm4, %v1117_v43, -inf  ;;  %v1576_v45 = vpop.f32.mrb[9].mxu1  ;;  %v1312_v43 = vld [vmem:[%s1911_s8 + $0x18] sm:$0xff] }
 0x23e   : > { %v1122_v46 = vsel %vm550_vm3, %v1121_v44, -inf  ;;  %v1484_v45 = vld [vmem:[%s1910_s7] ss:$0 sm:$0xff] }
 0x23f   : > { %1123 = vmax.xlane.f32.xlu1 %v1122_v46 }
 0x2c0   : > { %v628_v47 = vpop.xlane.xlu1 %627 }
 0x2c1   : > { %v629_v48 = vsub.f32 %v625_v32, %v628_v47  ;;  %v1309_v32 = vld [vmem:[%s1911_s8] sm:$0xff] }
 0x2c2   : > { %v1620_v34 = vpack.c.bf16 %v1310_v33, %v1309_v32 }
 0x2c3   : > { %v630_v49 = vmul.f32 1.442695, %v629_v48 }
 0x2c4   : > { %v791_v50 = vpop.xlane.xlu0 %790 }
 0x2c5   : > { %1646 = vpow2.f32 %v630_v49  ;;  %v792_v51 = vsub.f32 %v788_v36, %v791_v50  ;;  %v1486_v49 = vld [vmem:[%s1912_s9] ss:$0 sm:$0xff] }
 0x2c7   : > { %v793_v52 = vmul.f32 1.442695, %v792_v51 }
 0x2c8   : > { %v958_v53 = vpop.xlane.xlu0 %957 }
 0x2c9   : > { %1648 = vpow2.f32 %v793_v52  ;;  %v959_v54 = vsub.f32 %v955_v40, %v958_v53 }
 0x2cb   : > { %v960_v55 = vmul.f32 1.442695, %v959_v54 }
 0x2cc   : > { %v1124_v62 = vpop.xlane.xlu1 %1123 }
 0x2cd   : > { %1650 = vpow2.f32 %v960_v55  ;;  %v1125_v63 = vsub.f32 %v1121_v44, %v1124_v62 }
 0x2cf   : > { %v1647_v56 = vpop.eup %1646  ;;  %v1126_v0 = vmul.f32 1.442695, %v1125_v63 }
 0x2d0   : > { %v632_v57 = vsel %vm550_vm3, %v1647_v56, 0.0 }
 0x2d1   : > { %633 = vadd.xlane.f32.xlu0 %v632_v57  ;;  %1652 = vpow2.f32 %v1126_v0 }
 0x2d3   : > { %v1649_v58 = vpop.eup %1648 }
 0x2d4   : > { %v795_v59 = vsel %vm550_vm3, %v1649_v58, 0.0 }
 0x2d5   : > { %796 = vadd.xlane.f32.xlu1 %v795_v59 }
 0x2d7   : > { %v1651_v60 = vpop.eup %1650 }
 0x2d8   : > { %v962_v61 = vsel %vm550_vm3, %v1651_v60, 0.0 }
 0x2d9   : > { %963 = vadd.xlane.f32.xlu0 %v962_v61 }
 0x2db   : > { %v1653_v1 = vpop.eup %1652 }
 0x2dc   : > { %v1128_v2 = vsel %vm550_vm3, %v1653_v1, 0.0 }
 0x2e6   : > { %967 = vrot.lane.b32.xlu1 %v1801_v19, %s1678_s22  ;;  %s1682_s22 = smov 24  }
 0x2ef   : > { %801 = vrot.lane.b32.xlu0 %v1801_v19, %s1673_s17  ;;  %s1681_s17 = smov 16  }
 0x30a   : > { %1129 = vadd.xlane.f32.xlu1 %v1128_v2 }
 0x31b   : > { %1133 = vrot.lane.b32.xlu1 %v1801_v19, %s1679_s24 }
 0x35e   : > { %v634_v4 = vpop.xlane.xlu0 %633 }
 0x35f   : > { %1654 = vrcp.f32 %v634_v4 }
 0x362   : > { %v797_v5 = vpop.xlane.xlu1 %796 }
 0x363   : > { %1656 = vrcp.f32 %v797_v5 }
 0x366   : > { %v964_v7 = vpop.xlane.xlu0 %963  ;;  %v968_v14 = vpop.permute.xlu1 %967 }
 0x367   : > { %1658 = vrcp.f32 %v964_v7 }
 0x369   : > { %v1655_v8 = vpop.eup %1654 }
 0x36a   : > { %v636_v9 = vmul.f32 %v1655_v8, %v1647_v56  ;;  %v802_v10 = vpop.permute.xlu0 %801 }
 0x36c   : > { %1550 = vmatmul.mubr.msk.f32.vlgmr.msra.gmra.mrb[2].mxu0 %vm550_vm3, %v636_v9 }
 0x36d   : > { %v1657_v11 = vpop.eup %1656  ;;  %1558 = vmatpush3.msra.mxu0 %v802_v10  ;;  %1559 = vmatprep.mubr.msk.f32.mxu0 %vm1671_vm0, %v1672_v6 }
 0x36e   : > { %v799_v13 = vmul.f32 %v1657_v11, %v1649_v58  ;;  %1567 = vmatprep.subr.mxu0 %v1672_v6 }
 0x370   : > { %1560 = vmatmul.mubr.msk.f32.vlgmr.msra.gmra.mrb[4].mxu0 %vm550_vm3, %v799_v13 }
 0x371   : > { %v1659_v15 = vpop.eup %1658  ;;  %1568 = vmatpush3.msra.mxu0 %v968_v14  ;;  %1569 = vmatprep.mubr.msk.f32.mxu0 %vm1671_vm0, %v1672_v6 }
 0x372   : > { %v966_v16 = vmul.f32 %v1659_v15, %v1651_v60  ;;  %1577 = vmatprep.subr.mxu0 %v1672_v6 }
 0x374   : > { %1570 = vmatmul.mubr.msk.f32.vlgmr.msra.gmra.mrb[6].mxu0 %vm550_vm3, %v966_v16 }
 0x375   : > { %1579 = vmatprep.mubr.msk.f32.mxu0 %vm1671_vm0, %v1672_v6 }
 0x397   : > { %v1130_v17 = vpop.xlane.xlu1 %1129 }
 0x398   : > { %1660 = vrcp.f32 %v1130_v17 }
 0x39b   : > { %v1134_v18 = vpop.permute.xlu1 %1133 }
 0x39c   : > { %1578 = vmatpush3.msra.mxu0 %v1134_v18 }
 0x39d   : > { %1619 = vmatprep.subr.bf16.mxu0 %v1670_v3 }
 0x3a2   : > { %v1661_v19 = vpop.eup %1660 }
 0x3a3   : > { %v1132_v20 = vmul.f32 %v1661_v19, %v1653_v1 }
 0x3a5   : > { %1580 = vmatmul.mubr.msk.f32.vlgmr.msra.gmra.mrb[8].mxu0 %vm550_vm3, %v1132_v20 }
 0x3a6   : > { %1601 = vmatprep.mubr.msk.f32.mxu0 %vm1671_vm0, %v1672_v6  ;;  %1621 = vmatpush3.bf16.msra.mxu0 %v1620_v34 }
 0x3a7   : > { %1622 = vmatprep.subr.bf16.mxu0 %v1670_v3  ;;  %v1311_v3 = vld [vmem:[%s1911_s8 + $0x10] sm:$0xff] }
 0x3a8   : > { %v1623_v44 = vpack.c.bf16 %v1312_v43, %v1311_v3 }
 0x3aa   : > { %1624 = vmatpush3.bf16.msra.mxu0 %v1623_v44 }
 0x43f   : > { %v706_v6 = vpop.f32.mrb[2].mxu0 }
 0x440   : > { %v1551_v27 = vpop.f32.mrb[3].mxu0 }
 0x443   : > { %v873_v28 = vpop.f32.mrb[4].mxu0 }
 0x444   : > { %1210 = vrot.lane.b32.xlu0 %v873_v28, %s1680_s16  ;;  %v1561_v29 = vpop.f32.mrb[5].mxu0 }
 0x447   : > { %v1039_v30 = vpop.f32.mrb[6].mxu0 }
 0x448   : > { %1214 = vrot.lane.b32.xlu1 %v1039_v30, %s1681_s17  ;;  %v1571_v31 = vpop.f32.mrb[7].mxu0 }
 0x478   : > { %v1205_v35 = vpop.f32.mrb[8].mxu0 }
 0x479   : > { %1218 = vrot.lane.b32.xlu0 %v1205_v35, %s1682_s22  ;;  %v1581_v36 = vpop.f32.mrb[9].mxu0 }
 0x4b6   : > { %v1211_v37 = vpop.permute.xlu0 %1210 }
 0x4b7   : > { %v1221_v39 = vsel %vm550_vm3, %v706_v6, %v1211_v37 }
 0x4ba   : > { %v1215_v38 = vpop.permute.xlu1 %1214 }
 0x4bb   : > { %v1222_v40 = vsel %vm468_vm2, %v1221_v39, %v1215_v38 }
 0x4eb   : > { %v1219_v41 = vpop.permute.xlu0 %1218 }
 0x4ec   : > { %v1224_v42 = vsel %vm1223_vm5, %v1222_v40, %v1219_v41 }
 0x4ed   : > { %1591 = vmatmul.mubr.msk.f32.vlgmr.msra.gmra.mrb[10].mxu1 %vm385_vm1, %v1224_v42 }
 0x5c0   : > { %v1305_v46 = vpop.f32.mrb[10].mxu1 }
 0x5c1   : > { %v1306_v47 = vadd.f32 %v1484_v45, %v1305_v46  ;;  %v1592_v48 = vpop.f32.mrb[11].mxu1 }
 0x5c3   : > { %1602 = vmatmul.mubr.msk.f32.vlgmr.msra.gmra.mrb[10].mxu0 %vm385_vm1, %v1306_v47 }
 0x696   : > { %v1389_v50 = vpop.f32.mrb[10].mxu0 }
 0x697   : > { %v1390_v51 = vadd.f32 %v1486_v49, %v1389_v50  ;;  %v1603_v52 = vpop.f32.mrb[11].mxu0 }
 0x699   : > { %v1393_v53 = vadd.f32 %v1390_v51, %v1785_v12 }
 0x69b   : > { %1394 = vst.msk [vmem:[%s371_s15] sm:$0xff] %vm468_vm2, %v1393_v53 }
 0x69c PF: > { %s20_s13 = sadd.s32 1, %s1668_s13  }
 0x69d   : > { %p17_p4 = scmp.ge.s32.totalorder %s20_s13, 4  }
 0x69f   :  { %19 = sbr.rel (!%p17_p4) target bundleno = 1 (0x1), region = 93 }

</bundles_post_ra>
